<compile_context>
chip_gen: v5e
topology: v5e:2x2
jax: 0.10.0
libtpu: 0.0.40
codegen_flags: <defaults>
</compile_context>

<pallas_src>
import functools

import jax
import jax.numpy as jnp
from jax import lax
from jax.experimental import pallas as pl
from jax.experimental.pallas import tpu as pltpu


_VMEM_SPEC = pl.BlockSpec(memory_space=pltpu.MemorySpace.VMEM)
_UNROLL_LIMIT = 64  # fully unroll the time loop up to this many steps


def _round_up(x, m):
    return ((x + m - 1) // m) * m


# ----------------------------------------------------------------------------
# Fused GRU + softmax Pallas kernel
# ----------------------------------------------------------------------------
def _gru_softmax_kernel(x_ref, w_obs_ref, w_hh_ref, ib_ref, b_hn_ref,
                        out_ref, gi_ref, *, T, B, H, Hp, full_seq):
    """Single-layer GRU (PyTorch gate conventions, h0 = 0) + row softmax.

    x_ref:     (T*B, D_obs)  flattened time-major observations
    w_obs_ref: (D_obs, 3*Hp) obs part of weight_ih_l0, transposed + gate-padded
    w_hh_ref:  (Hp, 3*Hp)    weight_hh_l0, transposed + gate-padded
    ib_ref:    (B, 3*Hp)     effective input bias = b_ih + cond @ W_cond^T
                             (+ b_hh folded in for the r/z gate lanes)
    b_hn_ref:  (1, Hp)       hidden bias of the n gate (must stay inside r*(.))
    out_ref:   (T-1, B, Hp) if full_seq else (B, Hp)   (softmax-ed weights)
    gi_ref:    (T*B, 3*Hp)   VMEM scratch for the hoisted input projection
    """
    w_hh = w_hh_ref[...]
    ib = ib_ref[...]
    b_hn = b_hn_ref[...]

    # ---- hoisted input projection: one MXU matmul for all timesteps --------
    gi_ref[...] = jnp.dot(x_ref[...], w_obs_ref[...],
                          preferred_element_type=jnp.float32)

    def step(h, gi_t):
        # gi_t + ib is independent of h -> off the serial critical path.
        gi_t = gi_t + ib
        gh = jnp.dot(h, w_hh, preferred_element_type=jnp.float32)
        # fused sigmoid over the lane-aligned (r, z) gate span (b_hh_rz already
        # folded into ib in the wrapper)
        rz = jax.nn.sigmoid(gi_t[:, :2 * Hp] + gh[:, :2 * Hp])
        r = rz[:, :Hp]
        z = rz[:, Hp:]
        # PyTorch: n = tanh(W_in x + b_in + r * (W_hn h + b_hn))
        n = jnp.tanh(gi_t[:, 2 * Hp:] + r * (gh[:, 2 * Hp:] + b_hn))
        return (1.0 - z) * n + z * h

    n_steps = T - 1 if full_seq else T
    h0 = jnp.zeros((B, Hp), jnp.float32)

    if n_steps <= _UNROLL_LIMIT:
        # Fully-unrolled static time loop: the scheduler overlaps the gi load /
        # bias add of step t+1 with the EUP sigmoid/tanh latency of step t.
        # h stays in vregs.
        h = h0
        for t in range(n_steps):
            h = step(h, gi_ref[pl.ds(t * B, B), :])
            if full_seq:
                out_ref[t] = h            # raw hidden state; softmax batched below
    else:
        def body(t, h):
            row = pl.multiple_of(t * B, B)
            h = step(h, gi_ref[pl.ds(row, B), :])
            if full_seq:
                out_ref[t] = h
            return h
        h = lax.fori_loop(0, n_steps, body, h0, unroll=4)

    # ---- masked softmax, batched over all output rows (off the serial path) --
    if full_seq:
        d = out_ref[...]                                      # (T-1, B, Hp)
        col = lax.broadcasted_iota(jnp.int32, d.shape, 2)
    else:
        d = h                                                 # (B, Hp)
        col = lax.broadcasted_iota(jnp.int32, d.shape, 1)
    valid = col < H
    m = jnp.max(jnp.where(valid, d, -jnp.inf), axis=-1, keepdims=True)
    e = jnp.where(valid, jnp.exp(d - m), 0.0)
    s = jnp.sum(e, axis=-1, keepdims=True)
    inv = pl.reciprocal(s, approx=True)
    inv = inv * (2.0 - s * inv)            # one Newton step -> ~f32 accuracy
    out_ref[...] = e * inv


# ----------------------------------------------------------------------------
# Parameter preparation (done once, outside the jitted forward)
# ----------------------------------------------------------------------------
def init_weight_model_params(key, num_submodels, obs_dim, cond_dim=0):
    """Deterministic PyTorch-style GRU init: U(-1/sqrt(H), 1/sqrt(H))."""
    H = num_submodels
    D = obs_dim + cond_dim
    k = 1.0 / jnp.sqrt(jnp.float32(H))
    k1, k2, k3, k4 = jax.random.split(key, 4)
    return {
        "w_ih": jax.random.uniform(k1, (3 * H, D), jnp.float32, -k, k),
        "w_hh": jax.random.uniform(k2, (3 * H, H), jnp.float32, -k, k),
        "b_ih": jax.random.uniform(k3, (3 * H,), jnp.float32, -k, k),
        "b_hh": jax.random.uniform(k4, (3 * H,), jnp.float32, -k, k),
    }


def prepare_weight_model_params(params, num_submodels, obs_dim):
    """Convert PyTorch-layout GRU params to the transposed, gate-padded kernel
    layout (each gate occupies an Hp = round_up(H, 128) lane span)."""
    H = num_submodels
    Hp = _round_up(max(H, 1), 128)

    w_ih = jnp.asarray(params["w_ih"], jnp.float32)   # (3H, obs+cond)
    w_hh = jnp.asarray(params["w_hh"], jnp.float32)   # (3H, H)
    b_ih = jnp.asarray(params["b_ih"], jnp.float32)   # (3H,)
    b_hh = jnp.asarray(params["b_hh"], jnp.float32)   # (3H,)
    cond_dim = w_ih.shape[1] - obs_dim

    def pad_gate_cols(w_t):            # (rows, 3H) -> (rows, 3Hp)
        rows = w_t.shape[0]
        out = jnp.zeros((rows, 3 * Hp), jnp.float32)
        for g in range(3):
            out = out.at[:, g * Hp:g * Hp + H].set(w_t[:, g * H:(g + 1) * H])
        return out

    def pad_gate_bias(b):              # (3H,) -> (1, 3Hp)
        out = jnp.zeros((1, 3 * Hp), jnp.float32)
        for g in range(3):
            out = out.at[0, g * Hp:g * Hp + H].set(b[g * H:(g + 1) * H])
        return out

    w_ih_t = w_ih.T                                    # (obs+cond, 3H)
    w_obs_p = pad_gate_cols(w_ih_t[:obs_dim])          # (obs, 3Hp)
    if cond_dim > 0:
        w_cond_p = pad_gate_cols(w_ih_t[obs_dim:])     # (cond, 3Hp)
    else:
        w_cond_p = jnp.zeros((1, 3 * Hp), jnp.float32)  # placeholder (unused)

    w_hh_p = jnp.zeros((Hp, 3 * Hp), jnp.float32)
    w_hh_p = w_hh_p.at[:H].set(pad_gate_cols(w_hh.T))  # (Hp, 3Hp)

    return {
        "w_obs_p": w_obs_p,
        "w_cond_p": w_cond_p,
        "w_hh_p": w_hh_p,
        "b_ih_p": pad_gate_bias(b_ih),
        "b_hh_p": pad_gate_bias(b_hh),
    }


# ----------------------------------------------------------------------------
# Forward wrapper (matches WeightModel.forward semantics)
# ----------------------------------------------------------------------------
@functools.partial(jax.jit, static_argnames=("num_submodels", "full_seq"))
def weight_model_forward(prepared, y_hist, cond=None, *, num_submodels,
                         full_seq=False):
    """Pallas implementation of WeightModel.forward.

    y_hist: (T, B, obs_dim);  cond: (B, cond_dim) or None.
    Returns (B, num_submodels) [squeezed like torch] or (T-1, B, num_submodels).
    """
    T, B, obs_dim = y_hist.shape
    H = num_submodels
    Hp = prepared["w_hh_p"].shape[0]
    G3 = 3 * Hp

    # Effective per-batch input bias: b_ih (+ time-invariant cond @ W_cond^T)
    # with the hidden bias of the r/z gates folded in (b_hn must stay inside
    # the r * (W_hn h + b_hn) term, so it is passed separately).
    b_hh_p = prepared["b_hh_p"]                               # (1, 3Hp)
    rz_hidden_bias = jnp.concatenate(
        [b_hh_p[:, :2 * Hp], jnp.zeros((1, Hp), jnp.float32)], axis=1)
    ib = jnp.broadcast_to(prepared["b_ih_p"] + rz_hidden_bias,
                          (B, G3)).astype(jnp.float32)
    if cond is not None:
        if cond.ndim > 2:
            cond = cond[0]
        ib = ib + jnp.dot(cond.astype(jnp.float32), prepared["w_cond_p"])
    b_hn = b_hh_p[:, 2 * Hp:]                                 # (1, Hp)

    # (T, B, D) -> (T*B, D): free row-major reshape in the wrapper.
    x2 = y_hist.astype(jnp.float32).reshape(T * B, obs_dim)

    if full_seq:
        out_shape = jax.ShapeDtypeStruct((T - 1, B, Hp), jnp.float32)
    else:
        out_shape = jax.ShapeDtypeStruct((B, Hp), jnp.float32)

    kernel = functools.partial(_gru_softmax_kernel, T=T, B=B, H=H, Hp=Hp,
                               full_seq=full_seq)
    out = pl.pallas_call(
        kernel,
        out_shape=out_shape,
        in_specs=[_VMEM_SPEC] * 5,
        out_specs=_VMEM_SPEC,
        scratch_shapes=[pltpu.VMEM((T * B, G3), jnp.float32)],
    )(x2, prepared["w_obs_p"], prepared["w_hh_p"], ib, b_hn)

    if full_seq:
        return out[:, :, :H]                 # trim lane padding (lazy slice)
    # NOTE: jnp.squeeze also drops the submodel axis if num_submodels == 1,
    # matching torch's .squeeze() behavior.
    return jnp.squeeze(out[:, :H])


# ----------------------------------------------------------------------------
# Pure-JAX reference for validation (PyTorch GRU semantics)
# ----------------------------------------------------------------------------
def _ref_forward(params, y_hist, cond, num_submodels, full_seq):
    T, B, _ = y_hist.shape
    H = num_submodels
    if cond is None:
        x = y_hist
    else:
        x = jnp.concatenate(
            [y_hist, jnp.broadcast_to(cond[None], (T,) + cond.shape)], axis=-1)
    w_ih, w_hh = params["w_ih"], params["w_hh"]
    b_ih, b_hh = params["b_ih"], params["b_hh"]

    def step(h, x_t):
        gi = x_t @ w_ih.T + b_ih
        gh = h @ w_hh.T + b_hh
        r = jax.nn.sigmoid(gi[:, :H] + gh[:, :H])
        z = jax.nn.sigmoid(gi[:, H:2 * H] + gh[:, H:2 * H])
        n = jnp.tanh(gi[:, 2 * H:] + r * gh[:, 2 * H:])
        h_new = (1 - z) * n + z * h
        return h_new, h_new

    h0 = jnp.zeros((B, H), jnp.float32)
    _, h_all = lax.scan(step, h0, x.astype(jnp.float32))
    if full_seq:
        return jax.nn.softmax(h_all[0:-1], axis=-1)
    return jnp.squeeze(jax.nn.softmax(h_all[-1], axis=-1))


# ----------------------------------------------------------------------------
if __name__ == "__main__":
    T, B = 8, 2
    obs_dim, cond_dim, num_submodels = 5, 3, 6

    key = jax.random.PRNGKey(0)
    kp, ky, kc = jax.random.split(key, 3)
    params = init_weight_model_params(kp, num_submodels, obs_dim, cond_dim)
    prepared = prepare_weight_model_params(params, num_submodels, obs_dim)
    y_hist = jax.random.normal(ky, (T, B, obs_dim), jnp.float32)
    cond = jax.random.normal(kc, (B, cond_dim), jnp.float32)

    # Default path: last-step weights, shape (B, num_submodels)
    w_last = weight_model_forward(prepared, y_hist, cond,
                                  num_submodels=num_submodels, full_seq=False)
    w_last = jax.block_until_ready(w_last)

    # full_seq path: shape (T-1, B, num_submodels)
    w_seq = weight_model_forward(prepared, y_hist, cond,
                                 num_submodels=num_submodels, full_seq=True)
    w_seq = jax.block_until_ready(w_seq)

    # No-cond path (cond=None branch of the original module)
    params_nc = init_weight_model_params(kp, num_submodels, obs_dim, 0)
    prepared_nc = prepare_weight_model_params(params_nc, num_submodels, obs_dim)
    w_nc = weight_model_forward(prepared_nc, y_hist, None,
                                num_submodels=num_submodels, full_seq=False)
    w_nc = jax.block_until_ready(w_nc)

    # Validate against a pure-JAX reference of the PyTorch semantics.
    ref_last = _ref_forward(params, y_hist, cond, num_submodels, False)
    ref_seq = _ref_forward(params, y_hist, cond, num_submodels, True)
    ref_nc = _ref_forward(params_nc, y_hist, None, num_submodels, False)
    assert w_last.shape == (B, num_submodels)
    assert w_seq.shape == (T - 1, B, num_submodels)
    assert jnp.allclose(w_last, ref_last, atol=1e-4, rtol=1e-4)
    assert jnp.allclose(w_seq, ref_seq, atol=1e-4, rtol=1e-4)
    assert jnp.allclose(w_nc, ref_nc, atol=1e-4, rtol=1e-4)

    print("KERNEL_OK")
</pallas_src>

<mosaic_0001>
module attributes {stable_mosaic.version = 11 : i64} {
  func.func @_gru_softmax_kernel(%arg0: memref<16x5xf32, #tpu.memory_space<vmem>>, %arg1: memref<5x384xf32, #tpu.memory_space<vmem>>, %arg2: memref<128x384xf32, #tpu.memory_space<vmem>>, %arg3: memref<2x384xf32, #tpu.memory_space<vmem>>, %arg4: memref<1x128xf32, #tpu.memory_space<vmem>>, %arg5: memref<2x128xf32, #tpu.memory_space<vmem>>, %arg6: memref<16x384xf32, #tpu.memory_space<vmem>>) attributes {dimension_semantics = [], scalar_prefetch = 0 : i64, scratch_operands = 1 : i64, tpu.core_type = #tpu.core_type<tc>} {
    %c0 = arith.constant 0 : index
    %c0_0 = arith.constant 0 : index
    %0 = vector.load %arg2[%c0, %c0_0] : memref<128x384xf32, #tpu.memory_space<vmem>>, vector<128x384xf32>
    %c0_1 = arith.constant 0 : index
    %c0_2 = arith.constant 0 : index
    %1 = vector.load %arg3[%c0_1, %c0_2] : memref<2x384xf32, #tpu.memory_space<vmem>>, vector<2x384xf32>
    %c0_3 = arith.constant 0 : index
    %c0_4 = arith.constant 0 : index
    %2 = vector.load %arg4[%c0_3, %c0_4] : memref<1x128xf32, #tpu.memory_space<vmem>>, vector<1x128xf32>
    %c0_5 = arith.constant 0 : index
    %c0_6 = arith.constant 0 : index
    %3 = vector.load %arg0[%c0_5, %c0_6] : memref<16x5xf32, #tpu.memory_space<vmem>>, vector<16x5xf32>
    %c0_7 = arith.constant 0 : index
    %c0_8 = arith.constant 0 : index
    %4 = vector.load %arg1[%c0_7, %c0_8] : memref<5x384xf32, #tpu.memory_space<vmem>>, vector<5x384xf32>
    %cst = arith.constant dense<0.000000e+00> : vector<16x384xf32>
    %5 = tpu.matmul %3, %4, %cst {dimension_numbers = #tpu.dot_dimension_numbers<[1], [0], [0], [1], [0, 0, 1, 1], [], []>} : vector<16x5xf32>, vector<5x384xf32>, vector<16x384xf32> -> vector<16x384xf32>
    %c0_9 = arith.constant 0 : index
    %c0_10 = arith.constant 0 : index
    %6 = vector.load %arg6[%c0_9, %c0_10] : memref<16x384xf32, #tpu.memory_space<vmem>>, vector<16x384xf32>
    tpu.vector_store %arg6[%c0_9, %c0_10], %5 {strides = array<i32>} : memref<16x384xf32, #tpu.memory_space<vmem>>, vector<16x384xf32>,
    %cst_11 = arith.constant 0.000000e+00 : f32
    %7 = vector.broadcast %cst_11 : f32 to vector<2x128xf32>
    %c0_12 = arith.constant 0 : index
    %c0_13 = arith.constant 0 : index
    %8 = vector.load %arg6[%c0_12, %c0_13] : memref<16x384xf32, #tpu.memory_space<vmem>>, vector<2x384xf32>
    %9 = arith.addf %8, %1 : vector<2x384xf32>
    %cst_14 = arith.constant dense<0.000000e+00> : vector<2x384xf32>
    %10 = tpu.matmul %7, %0, %cst_14 {dimension_numbers = #tpu.dot_dimension_numbers<[1], [0], [0], [1], [0, 0, 1, 1], [], []>} : vector<2x128xf32>, vector<128x384xf32>, vector<2x384xf32> -> vector<2x384xf32>
    %11 = vector.extract_strided_slice %9 {offsets = [0, 0], sizes = [2, 256], strides = [1, 1]} : vector<2x384xf32> to vector<2x256xf32>
    %12 = vector.extract_strided_slice %10 {offsets = [0, 0], sizes = [2, 256], strides = [1, 1]} : vector<2x384xf32> to vector<2x256xf32>
    %13 = arith.addf %11, %12 : vector<2x256xf32>
    %14 = arith.negf %13 : vector<2x256xf32>
    %15 = math.exp %14 : vector<2x256xf32>
    %cst_15 = arith.constant 1.000000e+00 : f32
    %16 = vector.broadcast %cst_15 : f32 to vector<2x256xf32>
    %17 = arith.addf %16, %15 : vector<2x256xf32>
    %18 = arith.divf %16, %17 : vector<2x256xf32>
    %19 = vector.extract_strided_slice %18 {offsets = [0, 0], sizes = [2, 128], strides = [1, 1]} : vector<2x256xf32> to vector<2x128xf32>
    %20 = vector.extract_strided_slice %18 {offsets = [0, 128], sizes = [2, 128], strides = [1, 1]} : vector<2x256xf32> to vector<2x128xf32>
    %21 = vector.extract_strided_slice %9 {offsets = [0, 256], sizes = [2, 128], strides = [1, 1]} : vector<2x384xf32> to vector<2x128xf32>
    %22 = vector.extract_strided_slice %10 {offsets = [0, 256], sizes = [2, 128], strides = [1, 1]} : vector<2x384xf32> to vector<2x128xf32>
    %23 = vector.broadcast %2 : vector<1x128xf32> to vector<2x128xf32>
    %24 = arith.addf %22, %23 : vector<2x128xf32>
    %25 = arith.mulf %19, %24 : vector<2x128xf32>
    %26 = arith.addf %21, %25 : vector<2x128xf32>
    %27 = math.tanh %26 : vector<2x128xf32>
    %cst_16 = arith.constant 1.000000e+00 : f32
    %28 = vector.broadcast %cst_16 : f32 to vector<2x128xf32>
    %29 = arith.subf %28, %20 : vector<2x128xf32>
    %30 = arith.mulf %29, %27 : vector<2x128xf32>
    %31 = arith.mulf %20, %7 : vector<2x128xf32>
    %32 = arith.addf %30, %31 : vector<2x128xf32>
    %c2 = arith.constant 2 : index
    %c0_17 = arith.constant 0 : index
    %33 = vector.load %arg6[%c2, %c0_17] : memref<16x384xf32, #tpu.memory_space<vmem>>, vector<2x384xf32>
    %34 = arith.addf %33, %1 : vector<2x384xf32>
    %cst_18 = arith.constant dense<0.000000e+00> : vector<2x384xf32>
    %35 = tpu.matmul %32, %0, %cst_18 {dimension_numbers = #tpu.dot_dimension_numbers<[1], [0], [0], [1], [0, 0, 1, 1], [], []>} : vector<2x128xf32>, vector<128x384xf32>, vector<2x384xf32> -> vector<2x384xf32>
    %36 = vector.extract_strided_slice %34 {offsets = [0, 0], sizes = [2, 256], strides = [1, 1]} : vector<2x384xf32> to vector<2x256xf32>
    %37 = vector.extract_strided_slice %35 {offsets = [0, 0], sizes = [2, 256], strides = [1, 1]} : vector<2x384xf32> to vector<2x256xf32>
    %38 = arith.addf %36, %37 : vector<2x256xf32>
    %39 = arith.negf %38 : vector<2x256xf32>
    %40 = math.exp %39 : vector<2x256xf32>
    %cst_19 = arith.constant 1.000000e+00 : f32
    %41 = vector.broadcast %cst_19 : f32 to vector<2x256xf32>
    %42 = arith.addf %41, %40 : vector<2x256xf32>
    %43 = arith.divf %41, %42 : vector<2x256xf32>
    %44 = vector.extract_strided_slice %43 {offsets = [0, 0], sizes = [2, 128], strides = [1, 1]} : vector<2x256xf32> to vector<2x128xf32>
    %45 = vector.extract_strided_slice %43 {offsets = [0, 128], sizes = [2, 128], strides = [1, 1]} : vector<2x256xf32> to vector<2x128xf32>
    %46 = vector.extract_strided_slice %34 {offsets = [0, 256], sizes = [2, 128], strides = [1, 1]} : vector<2x384xf32> to vector<2x128xf32>
    %47 = vector.extract_strided_slice %35 {offsets = [0, 256], sizes = [2, 128], strides = [1, 1]} : vector<2x384xf32> to vector<2x128xf32>
    %48 = vector.broadcast %2 : vector<1x128xf32> to vector<2x128xf32>
    %49 = arith.addf %47, %48 : vector<2x128xf32>
    %50 = arith.mulf %44, %49 : vector<2x128xf32>
    %51 = arith.addf %46, %50 : vector<2x128xf32>
    %52 = math.tanh %51 : vector<2x128xf32>
    %cst_20 = arith.constant 1.000000e+00 : f32
    %53 = vector.broadcast %cst_20 : f32 to vector<2x128xf32>
    %54 = arith.subf %53, %45 : vector<2x128xf32>
    %55 = arith.mulf %54, %52 : vector<2x128xf32>
    %56 = arith.mulf %45, %32 : vector<2x128xf32>
    %57 = arith.addf %55, %56 : vector<2x128xf32>
    %c4 = arith.constant 4 : index
    %c0_21 = arith.constant 0 : index
    %58 = vector.load %arg6[%c4, %c0_21] : memref<16x384xf32, #tpu.memory_space<vmem>>, vector<2x384xf32>
    %59 = arith.addf %58, %1 : vector<2x384xf32>
    %cst_22 = arith.constant dense<0.000000e+00> : vector<2x384xf32>
    %60 = tpu.matmul %57, %0, %cst_22 {dimension_numbers = #tpu.dot_dimension_numbers<[1], [0], [0], [1], [0, 0, 1, 1], [], []>} : vector<2x128xf32>, vector<128x384xf32>, vector<2x384xf32> -> vector<2x384xf32>
    %61 = vector.extract_strided_slice %59 {offsets = [0, 0], sizes = [2, 256], strides = [1, 1]} : vector<2x384xf32> to vector<2x256xf32>
    %62 = vector.extract_strided_slice %60 {offsets = [0, 0], sizes = [2, 256], strides = [1, 1]} : vector<2x384xf32> to vector<2x256xf32>
    %63 = arith.addf %61, %62 : vector<2x256xf32>
    %64 = arith.negf %63 : vector<2x256xf32>
    %65 = math.exp %64 : vector<2x256xf32>
    %cst_23 = arith.constant 1.000000e+00 : f32
    %66 = vector.broadcast %cst_23 : f32 to vector<2x256xf32>
    %67 = arith.addf %66, %65 : vector<2x256xf32>
    %68 = arith.divf %66, %67 : vector<2x256xf32>
    %69 = vector.extract_strided_slice %68 {offsets = [0, 0], sizes = [2, 128], strides = [1, 1]} : vector<2x256xf32> to vector<2x128xf32>
    %70 = vector.extract_strided_slice %68 {offsets = [0, 128], sizes = [2, 128], strides = [1, 1]} : vector<2x256xf32> to vector<2x128xf32>
    %71 = vector.extract_strided_slice %59 {offsets = [0, 256], sizes = [2, 128], strides = [1, 1]} : vector<2x384xf32> to vector<2x128xf32>
    %72 = vector.extract_strided_slice %60 {offsets = [0, 256], sizes = [2, 128], strides = [1, 1]} : vector<2x384xf32> to vector<2x128xf32>
    %73 = vector.broadcast %2 : vector<1x128xf32> to vector<2x128xf32>
    %74 = arith.addf %72, %73 : vector<2x128xf32>
    %75 = arith.mulf %69, %74 : vector<2x128xf32>
    %76 = arith.addf %71, %75 : vector<2x128xf32>
    %77 = math.tanh %76 : vector<2x128xf32>
    %cst_24 = arith.constant 1.000000e+00 : f32
    %78 = vector.broadcast %cst_24 : f32 to vector<2x128xf32>
    %79 = arith.subf %78, %70 : vector<2x128xf32>
    %80 = arith.mulf %79, %77 : vector<2x128xf32>
    %81 = arith.mulf %70, %57 : vector<2x128xf32>
    %82 = arith.addf %80, %81 : vector<2x128xf32>
    %c6 = arith.constant 6 : index
    %c0_25 = arith.constant 0 : index
    %83 = vector.load %arg6[%c6, %c0_25] : memref<16x384xf32, #tpu.memory_space<vmem>>, vector<2x384xf32>
    %84 = arith.addf %83, %1 : vector<2x384xf32>
    %cst_26 = arith.constant dense<0.000000e+00> : vector<2x384xf32>
    %85 = tpu.matmul %82, %0, %cst_26 {dimension_numbers = #tpu.dot_dimension_numbers<[1], [0], [0], [1], [0, 0, 1, 1], [], []>} : vector<2x128xf32>, vector<128x384xf32>, vector<2x384xf32> -> vector<2x384xf32>
    %86 = vector.extract_strided_slice %84 {offsets = [0, 0], sizes = [2, 256], strides = [1, 1]} : vector<2x384xf32> to vector<2x256xf32>
    %87 = vector.extract_strided_slice %85 {offsets = [0, 0], sizes = [2, 256], strides = [1, 1]} : vector<2x384xf32> to vector<2x256xf32>
    %88 = arith.addf %86, %87 : vector<2x256xf32>
    %89 = arith.negf %88 : vector<2x256xf32>
    %90 = math.exp %89 : vector<2x256xf32>
    %cst_27 = arith.constant 1.000000e+00 : f32
    %91 = vector.broadcast %cst_27 : f32 to vector<2x256xf32>
    %92 = arith.addf %91, %90 : vector<2x256xf32>
    %93 = arith.divf %91, %92 : vector<2x256xf32>
    %94 = vector.extract_strided_slice %93 {offsets = [0, 0], sizes = [2, 128], strides = [1, 1]} : vector<2x256xf32> to vector<2x128xf32>
    %95 = vector.extract_strided_slice %93 {offsets = [0, 128], sizes = [2, 128], strides = [1, 1]} : vector<2x256xf32> to vector<2x128xf32>
    %96 = vector.extract_strided_slice %84 {offsets = [0, 256], sizes = [2, 128], strides = [1, 1]} : vector<2x384xf32> to vector<2x128xf32>
    %97 = vector.extract_strided_slice %85 {offsets = [0, 256], sizes = [2, 128], strides = [1, 1]} : vector<2x384xf32> to vector<2x128xf32>
    %98 = vector.broadcast %2 : vector<1x128xf32> to vector<2x128xf32>
    %99 = arith.addf %97, %98 : vector<2x128xf32>
    %100 = arith.mulf %94, %99 : vector<2x128xf32>
    %101 = arith.addf %96, %100 : vector<2x128xf32>
    %102 = math.tanh %101 : vector<2x128xf32>
    %cst_28 = arith.constant 1.000000e+00 : f32
    %103 = vector.broadcast %cst_28 : f32 to vector<2x128xf32>
    %104 = arith.subf %103, %95 : vector<2x128xf32>
    %105 = arith.mulf %104, %102 : vector<2x128xf32>
    %106 = arith.mulf %95, %82 : vector<2x128xf32>
    %107 = arith.addf %105, %106 : vector<2x128xf32>
    %c8 = arith.constant 8 : index
    %c0_29 = arith.constant 0 : index
    %108 = vector.load %arg6[%c8, %c0_29] : memref<16x384xf32, #tpu.memory_space<vmem>>, vector<2x384xf32>
    %109 = arith.addf %108, %1 : vector<2x384xf32>
    %cst_30 = arith.constant dense<0.000000e+00> : vector<2x384xf32>
    %110 = tpu.matmul %107, %0, %cst_30 {dimension_numbers = #tpu.dot_dimension_numbers<[1], [0], [0], [1], [0, 0, 1, 1], [], []>} : vector<2x128xf32>, vector<128x384xf32>, vector<2x384xf32> -> vector<2x384xf32>
    %111 = vector.extract_strided_slice %109 {offsets = [0, 0], sizes = [2, 256], strides = [1, 1]} : vector<2x384xf32> to vector<2x256xf32>
    %112 = vector.extract_strided_slice %110 {offsets = [0, 0], sizes = [2, 256], strides = [1, 1]} : vector<2x384xf32> to vector<2x256xf32>
    %113 = arith.addf %111, %112 : vector<2x256xf32>
    %114 = arith.negf %113 : vector<2x256xf32>
    %115 = math.exp %114 : vector<2x256xf32>
    %cst_31 = arith.constant 1.000000e+00 : f32
    %116 = vector.broadcast %cst_31 : f32 to vector<2x256xf32>
    %117 = arith.addf %116, %115 : vector<2x256xf32>
    %118 = arith.divf %116, %117 : vector<2x256xf32>
    %119 = vector.extract_strided_slice %118 {offsets = [0, 0], sizes = [2, 128], strides = [1, 1]} : vector<2x256xf32> to vector<2x128xf32>
    %120 = vector.extract_strided_slice %118 {offsets = [0, 128], sizes = [2, 128], strides = [1, 1]} : vector<2x256xf32> to vector<2x128xf32>
    %121 = vector.extract_strided_slice %109 {offsets = [0, 256], sizes = [2, 128], strides = [1, 1]} : vector<2x384xf32> to vector<2x128xf32>
    %122 = vector.extract_strided_slice %110 {offsets = [0, 256], sizes = [2, 128], strides = [1, 1]} : vector<2x384xf32> to vector<2x128xf32>
    %123 = vector.broadcast %2 : vector<1x128xf32> to vector<2x128xf32>
    %124 = arith.addf %122, %123 : vector<2x128xf32>
    %125 = arith.mulf %119, %124 : vector<2x128xf32>
    %126 = arith.addf %121, %125 : vector<2x128xf32>
    %127 = math.tanh %126 : vector<2x128xf32>
    %cst_32 = arith.constant 1.000000e+00 : f32
    %128 = vector.broadcast %cst_32 : f32 to vector<2x128xf32>
    %129 = arith.subf %128, %120 : vector<2x128xf32>
    %130 = arith.mulf %129, %127 : vector<2x128xf32>
    %131 = arith.mulf %120, %107 : vector<2x128xf32>
    %132 = arith.addf %130, %131 : vector<2x128xf32>
    %c10 = arith.constant 10 : index
    %c0_33 = arith.constant 0 : index
    %133 = vector.load %arg6[%c10, %c0_33] : memref<16x384xf32, #tpu.memory_space<vmem>>, vector<2x384xf32>
    %134 = arith.addf %133, %1 : vector<2x384xf32>
    %cst_34 = arith.constant dense<0.000000e+00> : vector<2x384xf32>
    %135 = tpu.matmul %132, %0, %cst_34 {dimension_numbers = #tpu.dot_dimension_numbers<[1], [0], [0], [1], [0, 0, 1, 1], [], []>} : vector<2x128xf32>, vector<128x384xf32>, vector<2x384xf32> -> vector<2x384xf32>
    %136 = vector.extract_strided_slice %134 {offsets = [0, 0], sizes = [2, 256], strides = [1, 1]} : vector<2x384xf32> to vector<2x256xf32>
    %137 = vector.extract_strided_slice %135 {offsets = [0, 0], sizes = [2, 256], strides = [1, 1]} : vector<2x384xf32> to vector<2x256xf32>
    %138 = arith.addf %136, %137 : vector<2x256xf32>
    %139 = arith.negf %138 : vector<2x256xf32>
    %140 = math.exp %139 : vector<2x256xf32>
    %cst_35 = arith.constant 1.000000e+00 : f32
    %141 = vector.broadcast %cst_35 : f32 to vector<2x256xf32>
    %142 = arith.addf %141, %140 : vector<2x256xf32>
    %143 = arith.divf %141, %142 : vector<2x256xf32>
    %144 = vector.extract_strided_slice %143 {offsets = [0, 0], sizes = [2, 128], strides = [1, 1]} : vector<2x256xf32> to vector<2x128xf32>
    %145 = vector.extract_strided_slice %143 {offsets = [0, 128], sizes = [2, 128], strides = [1, 1]} : vector<2x256xf32> to vector<2x128xf32>
    %146 = vector.extract_strided_slice %134 {offsets = [0, 256], sizes = [2, 128], strides = [1, 1]} : vector<2x384xf32> to vector<2x128xf32>
    %147 = vector.extract_strided_slice %135 {offsets = [0, 256], sizes = [2, 128], strides = [1, 1]} : vector<2x384xf32> to vector<2x128xf32>
    %148 = vector.broadcast %2 : vector<1x128xf32> to vector<2x128xf32>
    %149 = arith.addf %147, %148 : vector<2x128xf32>
    %150 = arith.mulf %144, %149 : vector<2x128xf32>
    %151 = arith.addf %146, %150 : vector<2x128xf32>
    %152 = math.tanh %151 : vector<2x128xf32>
    %cst_36 = arith.constant 1.000000e+00 : f32
    %153 = vector.broadcast %cst_36 : f32 to vector<2x128xf32>
    %154 = arith.subf %153, %145 : vector<2x128xf32>
    %155 = arith.mulf %154, %152 : vector<2x128xf32>
    %156 = arith.mulf %145, %132 : vector<2x128xf32>
    %157 = arith.addf %155, %156 : vector<2x128xf32>
    %c12 = arith.constant 12 : index
    %c0_37 = arith.constant 0 : index
    %158 = vector.load %arg6[%c12, %c0_37] : memref<16x384xf32, #tpu.memory_space<vmem>>, vector<2x384xf32>
    %159 = arith.addf %158, %1 : vector<2x384xf32>
    %cst_38 = arith.constant dense<0.000000e+00> : vector<2x384xf32>
    %160 = tpu.matmul %157, %0, %cst_38 {dimension_numbers = #tpu.dot_dimension_numbers<[1], [0], [0], [1], [0, 0, 1, 1], [], []>} : vector<2x128xf32>, vector<128x384xf32>, vector<2x384xf32> -> vector<2x384xf32>
    %161 = vector.extract_strided_slice %159 {offsets = [0, 0], sizes = [2, 256], strides = [1, 1]} : vector<2x384xf32> to vector<2x256xf32>
    %162 = vector.extract_strided_slice %160 {offsets = [0, 0], sizes = [2, 256], strides = [1, 1]} : vector<2x384xf32> to vector<2x256xf32>
    %163 = arith.addf %161, %162 : vector<2x256xf32>
    %164 = arith.negf %163 : vector<2x256xf32>
    %165 = math.exp %164 : vector<2x256xf32>
    %cst_39 = arith.constant 1.000000e+00 : f32
    %166 = vector.broadcast %cst_39 : f32 to vector<2x256xf32>
    %167 = arith.addf %166, %165 : vector<2x256xf32>
    %168 = arith.divf %166, %167 : vector<2x256xf32>
    %169 = vector.extract_strided_slice %168 {offsets = [0, 0], sizes = [2, 128], strides = [1, 1]} : vector<2x256xf32> to vector<2x128xf32>
    %170 = vector.extract_strided_slice %168 {offsets = [0, 128], sizes = [2, 128], strides = [1, 1]} : vector<2x256xf32> to vector<2x128xf32>
    %171 = vector.extract_strided_slice %159 {offsets = [0, 256], sizes = [2, 128], strides = [1, 1]} : vector<2x384xf32> to vector<2x128xf32>
    %172 = vector.extract_strided_slice %160 {offsets = [0, 256], sizes = [2, 128], strides = [1, 1]} : vector<2x384xf32> to vector<2x128xf32>
    %173 = vector.broadcast %2 : vector<1x128xf32> to vector<2x128xf32>
    %174 = arith.addf %172, %173 : vector<2x128xf32>
    %175 = arith.mulf %169, %174 : vector<2x128xf32>
    %176 = arith.addf %171, %175 : vector<2x128xf32>
    %177 = math.tanh %176 : vector<2x128xf32>
    %cst_40 = arith.constant 1.000000e+00 : f32
    %178 = vector.broadcast %cst_40 : f32 to vector<2x128xf32>
    %179 = arith.subf %178, %170 : vector<2x128xf32>
    %180 = arith.mulf %179, %177 : vector<2x128xf32>
    %181 = arith.mulf %170, %157 : vector<2x128xf32>
    %182 = arith.addf %180, %181 : vector<2x128xf32>
    %c14 = arith.constant 14 : index
    %c0_41 = arith.constant 0 : index
    %183 = vector.load %arg6[%c14, %c0_41] : memref<16x384xf32, #tpu.memory_space<vmem>>, vector<2x384xf32>
    %184 = arith.addf %183, %1 : vector<2x384xf32>
    %cst_42 = arith.constant dense<0.000000e+00> : vector<2x384xf32>
    %185 = tpu.matmul %182, %0, %cst_42 {dimension_numbers = #tpu.dot_dimension_numbers<[1], [0], [0], [1], [0, 0, 1, 1], [], []>} : vector<2x128xf32>, vector<128x384xf32>, vector<2x384xf32> -> vector<2x384xf32>
    %186 = vector.extract_strided_slice %184 {offsets = [0, 0], sizes = [2, 256], strides = [1, 1]} : vector<2x384xf32> to vector<2x256xf32>
    %187 = vector.extract_strided_slice %185 {offsets = [0, 0], sizes = [2, 256], strides = [1, 1]} : vector<2x384xf32> to vector<2x256xf32>
    %188 = arith.addf %186, %187 : vector<2x256xf32>
    %189 = arith.negf %188 : vector<2x256xf32>
    %190 = math.exp %189 : vector<2x256xf32>
    %cst_43 = arith.constant 1.000000e+00 : f32
    %191 = vector.broadcast %cst_43 : f32 to vector<2x256xf32>
    %192 = arith.addf %191, %190 : vector<2x256xf32>
    %193 = arith.divf %191, %192 : vector<2x256xf32>
    %194 = vector.extract_strided_slice %193 {offsets = [0, 0], sizes = [2, 128], strides = [1, 1]} : vector<2x256xf32> to vector<2x128xf32>
    %195 = vector.extract_strided_slice %193 {offsets = [0, 128], sizes = [2, 128], strides = [1, 1]} : vector<2x256xf32> to vector<2x128xf32>
    %196 = vector.extract_strided_slice %184 {offsets = [0, 256], sizes = [2, 128], strides = [1, 1]} : vector<2x384xf32> to vector<2x128xf32>
    %197 = vector.extract_strided_slice %185 {offsets = [0, 256], sizes = [2, 128], strides = [1, 1]} : vector<2x384xf32> to vector<2x128xf32>
    %198 = vector.broadcast %2 : vector<1x128xf32> to vector<2x128xf32>
    %199 = arith.addf %197, %198 : vector<2x128xf32>
    %200 = arith.mulf %194, %199 : vector<2x128xf32>
    %201 = arith.addf %196, %200 : vector<2x128xf32>
    %202 = math.tanh %201 : vector<2x128xf32>
    %cst_44 = arith.constant 1.000000e+00 : f32
    %203 = vector.broadcast %cst_44 : f32 to vector<2x128xf32>
    %204 = arith.subf %203, %195 : vector<2x128xf32>
    %205 = arith.mulf %204, %202 : vector<2x128xf32>
    %206 = arith.mulf %195, %182 : vector<2x128xf32>
    %207 = arith.addf %205, %206 : vector<2x128xf32>
    %208 = tpu.iota {dimensions = array<i32: 1>} : vector<2x128xi32>
    %c6_i32 = arith.constant 6 : i32
    %209 = vector.broadcast %c6_i32 : i32 to vector<2x128xi32>
    %210 = arith.cmpi slt, %208, %209 : vector<2x128xi32>
    %cst_45 = arith.constant 0xFF800000 : f32
    %211 = vector.broadcast %cst_45 : f32 to vector<2x128xf32>
    %212 = arith.select %210, %207, %211 : vector<2x128xi1>, vector<2x128xf32>
    %cst_46 = arith.constant dense<0xFF800000> : vector<2xf32>
    %213 = vector.multi_reduction <maximumf>, %212, %cst_46 [1] : vector<2x128xf32> to vector<2xf32>
    %214 = vector.shape_cast %213 : vector<2xf32> to vector<2x1xf32>
    %215 = vector.broadcast %214 : vector<2x1xf32> to vector<2x128xf32>
    %216 = arith.subf %207, %215 : vector<2x128xf32>
    %217 = math.exp %216 : vector<2x128xf32>
    %cst_47 = arith.constant 0.000000e+00 : f32
    %218 = vector.broadcast %cst_47 : f32 to vector<2x128xf32>
    %219 = arith.select %210, %217, %218 : vector<2x128xi1>, vector<2x128xf32>
    %cst_48 = arith.constant dense<0.000000e+00> : vector<2xf32>
    %220 = vector.multi_reduction <add>, %219, %cst_48 [1] : vector<2x128xf32> to vector<2xf32>
    %221 = vector.shape_cast %220 : vector<2xf32> to vector<2x1xf32>
    %222 = tpu.reciprocal %221 {approx = true} : vector<2x1xf32> -> vector<2x1xf32>
    %223 = arith.mulf %221, %222 : vector<2x1xf32>
    %cst_49 = arith.constant 2.000000e+00 : f32
    %224 = vector.broadcast %cst_49 : f32 to vector<2x1xf32>
    %225 = arith.subf %224, %223 : vector<2x1xf32>
    %226 = arith.mulf %222, %225 : vector<2x1xf32>
    %227 = vector.broadcast %226 : vector<2x1xf32> to vector<2x128xf32>
    %228 = arith.mulf %219, %227 : vector<2x128xf32>
    %c0_50 = arith.constant 0 : index
    %c0_51 = arith.constant 0 : index
    %229 = vector.load %arg5[%c0_50, %c0_51] : memref<2x128xf32, #tpu.memory_space<vmem>>, vector<2x128xf32>
    tpu.vector_store %arg5[%c0_50, %c0_51], %228 {strides = array<i32>} : memref<2x128xf32, #tpu.memory_space<vmem>>, vector<2x128xf32>,
    return
  }
}

</mosaic_0001>

<bundles_post_ra>
// kernel: weight_model_forward.1
= control target key start
LH: loop header
LB: loop body
LE: loop exit
PB: predicated region body
PF: predicated region fallthrough
CT: control target
= control target key end

     0   :  { %10 = vsyncpa [#allocation4], 0  ;;  %s2273_s0 = inlined_call_operand.vmem [shape: f32[16,5], index: 0, kind: input, shape index: {}]   ;;  %s2274_s1 = inlined_call_operand.vmem [shape: f32[5,384], index: 1, kind: input, shape index: {}]   ;;  %s2275_s2 = inlined_call_operand.hbm [shape: f32[128,384], index: 2, kind: input, shape index: {}]   ;;  %s2276_s3 = inlined_call_operand.vmem [shape: f32[2,384], index: 3, kind: input, shape index: {}]   ;;  %s2277_s4 = inlined_call_operand.vmem [shape: f32[1,128], index: 4, kind: input, shape index: {}]   ;;  %s2278_s5 = inlined_call_operand.hbm [shape: f32[2,128], index: 5, kind: output, shape index: {}]  }
   0x1   :  { %11 = vsyncpa [#allocation5], 0  ;;  %s20_s20 = sshll.u32 %s2275_s2, 4  ;;  %s1499_s21 = smov [#allocation3]   ;;  %s21_s20 = int_to_ptr.hbm [resolvable:$true] %s20_s20 }
   0x2   :  { %s22_s22 = sshll.u32 %s1499_s21, 4  ;;  %s1500_s23 = smov 384   ;;  %s23_s22 = int_to_ptr.vmem [resolvable:$true] %s22_s22 }
   0x3   :  { %s1501_s24 = smov 24  }
   0x4   :  { %28 = dma.hbm_to_vmem [thread:$0]  %s21_s20, 6144, %s23_s22, [#allocation4], %s1500_s23, %s1500_s23, %s1501_s24  }
   0x5   :  { %1495 = dma.done.wait [#allocation4], 6144  }
   0x6   :  { %1496 = vsyncadd [#allocation4], 4294961152  ;;  %vm99_vm0 = vcmask 1044480   ;;  %v1537_v0 = vld [vmem:[#allocation3 + $0x168] sm:$0xff]  ;;  %v1542_v2 = vld [vmem:[#allocation3 + $0x150] sm:$0xff]  ;;  %vm92_vm1 = vcmask 39936  }
   0x7   :  { %v89_v1 = vld [vmem:[%s2274_s1] sm:$0x1f]  ;;  %198 = vmatpush.msra.mxu3 %v1537_v0  ;;  %v1546_v3 = vld [vmem:[#allocation3 + $0x170] sm:$0xff]  ;;  %v1548_v4 = vld [vmem:[#allocation3 + $0x158] sm:$0xff]  ;;  %v1502_v47 = vmov 0.0   ;;  %s1273_s15 = sshll.u32 %s2278_s5, 4  ;;  %s1274_s15 = int_to_ptr.hbm [resolvable:$true] %s1273_s15 }
   0x8   :  { %1283 = vmatpush.msk.msra.mxu0 %vm99_vm0, %v89_v1  ;;  %v1551_v5 = vld [vmem:[#allocation3 + $0x138] sm:$0xff]  ;;  %v1554_v6 = vld [vmem:[#allocation3 + $0x140] sm:$0xff]  ;;  %v1560_v8 = vld [vmem:[#allocation3 + $0x128] sm:$0xff] }
   0x9   :  { %199 = vmatpush.msra.mxu3 %v1542_v2  ;;  %v1557_v7 = vld [vmem:[#allocation3 + $0x120] sm:$0xff]  ;;  %v1563_v9 = vld [vmem:[#allocation3 + $0x108] sm:$0xff]  ;;  %v1569_v11 = vld [vmem:[#allocation3 + $0x110] sm:$0xff] }
   0xa   :  { %218 = vmatpush.msrb.mxu0 %v1546_v3  ;;  %v87_v10 = vld [vmem:[%s2273_s0] sm:$0xff]  ;;  %v90_v12 = vld [vmem:[%s2274_s1 + $0x8] sm:$0x1f]  ;;  %v1580_v14 = vld [vmem:[#allocation3 + $0xf8] sm:$0xff] }
   0xb   :  { %200 = vmatpush.msra.mxu3 %v1551_v5  ;;  %1284 = vmatmul.msk.f32.vlgmr.msra.gmra.mxu0 %vm92_vm1, %v87_v10  ;;  %v1576_v13 = vld [vmem:[#allocation3 + $0xf0] sm:$0xff]  ;;  %v1584_v15 = vld [vmem:[#allocation3 + $0xd8] sm:$0xff]  ;;  %v1587_v16 = vld [vmem:[#allocation3 + $0xe0] sm:$0xff] }
   0xc   :  { %219 = vmatpush.msrb.mxu0 %v1548_v4  ;;  %1286 = vmatpush.msk.msra.mxu1 %vm99_vm0, %v90_v12  ;;  %v1590_v17 = vld [vmem:[#allocation3 + $0xc0] sm:$0xff]  ;;  %v1595_v18 = vld [vmem:[%s2273_s0 + $0x8] sm:$0xff]  ;;  %v1597_v19 = vld [vmem:[#allocation3 + $0x178] sm:$0xff] }
   0xd   :  { %201 = vmatpush.msra.mxu3 %v1557_v7  ;;  %1287 = vmatmul.msk.f32.vlgmr.msra.gmra.mxu1 %vm92_vm1, %v87_v10  ;;  %v1600_v20 = vld [vmem:[#allocation3 + $0xc8] sm:$0xff]  ;;  %v1603_v21 = vld [vmem:[#allocation3 + $0x160] sm:$0xff]  ;;  %v1609_v23 = vld [vmem:[#allocation3 + $0xb0] sm:$0xff] }
   0xe   :  { %220 = vmatpush.msrb.mxu0 %v1554_v6  ;;  %238 = vmatpush.msrb.mxu1 %v1597_v19  ;;  %v1606_v22 = vld [vmem:[#allocation3 + $0xa8] sm:$0xff]  ;;  %v91_v25 = vld [vmem:[%s2274_s1 + $0x10] sm:$0x1f]  ;;  %v1619_v26 = vld [vmem:[#allocation3 + $0x90] sm:$0xff] }
   0xf   :  { %202 = vmatpush.msra.mxu3 %v1563_v9  ;;  %v1613_v24 = vld [vmem:[#allocation3 + $0x148] sm:$0xff]  ;;  %v1623_v27 = vld [vmem:[#allocation3 + $0x98] sm:$0xff]  ;;  %v1625_v28 = vld [vmem:[#allocation3 + $0x130] sm:$0xff]  ;;  %1289 = vmatpush.msk.msra.mxu2 %vm99_vm0, %v91_v25 }
  0x10   :  { %221 = vmatpush.msrb.mxu0 %v1560_v8  ;;  %239 = vmatpush.msrb.mxu1 %v1603_v21  ;;  %v1629_v29 = vld [vmem:[#allocation3 + $0x78] sm:$0xff]  ;;  %v1633_v30 = vld [vmem:[#allocation3 + $0x80] sm:$0xff]  ;;  %v1643_v33 = vld [vmem:[#allocation3 + $0x68] sm:$0xff] }
  0x11   :  { %203 = vmatpush.msra.mxu3 %v1576_v13  ;;  %v1635_v31 = vld [vmem:[#allocation3 + $0x118] sm:$0xff]  ;;  %1290 = vmatmul.msk.f32.vlgmr.msra.gmra.mxu2 %vm92_vm1, %v87_v10  ;;  %v1639_v32 = vld [vmem:[#allocation3 + $0x60] sm:$0xff]  ;;  %v1650_v35 = vld [vmem:[#allocation3 + $0x48] sm:$0xff] }
  0x12   :  { %222 = vmatpush.msrb.mxu0 %v1569_v11  ;;  %240 = vmatpush.msrb.mxu1 %v1613_v24  ;;  %v1645_v34 = vld [vmem:[#allocation3 + $0x100] sm:$0xff]  ;;  %v1654_v36 = vld [vmem:[#allocation3 + $0x50] sm:$0xff]  ;;  %v1656_v37 = vld [vmem:[#allocation3 + $0xe8] sm:$0xff] }
  0x13   :  { %204 = vmatpush.msra.mxu3 %v1584_v15  ;;  %1285 = vmatmul.msk.f32.gmra.mxu0 %vm92_vm1, %v1595_v18  ;;  %2304 = vst [vmem:[#allocation9_spill] sm:$0xff] %v1654_v36  ;;  %v1660_v38 = vld [vmem:[#allocation3 + $0x30] sm:$0xff]  ;;  %v1664_v39 = vld [vmem:[#allocation3 + $0x38] sm:$0xff]  ;;  %v1674_v42 = vld [vmem:[#allocation3 + $0x20] sm:$0xff] }
  0x14   :  { %223 = vmatpush.msrb.mxu0 %v1580_v14  ;;  %241 = vmatpush.msrb.mxu1 %v1625_v28  ;;  %2305 = vst [vmem:[#allocation10_spill] sm:$0xff] %v1660_v38  ;;  %v1666_v40 = vld [vmem:[#allocation3 + $0xd0] sm:$0xff]  ;;  %v1670_v41 = vld [vmem:[#allocation3 + $0x18] sm:$0xff]  ;;  %v1680_v44 = vld [vmem:[#allocation3] sm:$0xff] }
  0x15   :  { %205 = vmatpush.msra.mxu3 %v1590_v17  ;;  %1288 = vmatmul.msk.f32.gmra.mxu1 %vm92_vm1, %v1595_v18  ;;  %2306 = vst [vmem:[#allocation11_spill] sm:$0xff] %v1664_v39  ;;  %v1676_v43 = vld [vmem:[#allocation3 + $0xb8] sm:$0xff]  ;;  %v1684_v45 = vld [vmem:[#allocation3 + $0x8] sm:$0xff]  ;;  %v1689_v46 = vld [vmem:[#allocation3 + $0xa0] sm:$0xff] }
  0x16   :  { %224 = vmatpush.msrb.mxu0 %v1587_v16  ;;  %242 = vmatpush.msrb.mxu1 %v1635_v31  ;;  %2307 = vst [vmem:[#allocation12_spill] sm:$0xff] %v1670_v41  ;;  %v1694_v48 = vld [vmem:[#allocation3 + $0x88] sm:$0xff]  ;;  %v1697_v49 = vld [vmem:[#allocation3 + $0x70] sm:$0xff]  ;;  %v1703_v50 = vld [vmem:[#allocation3 + $0x58] sm:$0xff] }
  0x17   :  { %206 = vmatpush.msra.mxu3 %v1606_v22  ;;  %323 = vmatpush.msrb.mxu2 %v1537_v0  ;;  %2308 = vst [vmem:[#allocation13_spill] sm:$0xff] %v1674_v42  ;;  %v1709_v51 = vld [vmem:[#allocation3 + $0x40] sm:$0xff]  ;;  %v1715_v52 = vld [vmem:[#allocation3 + $0x28] sm:$0xff]  ;;  %v1721_v53 = vld [vmem:[#allocation3 + $0x10] sm:$0xff] }
  0x18   :  { %225 = vmatpush.msrb.mxu0 %v1600_v20  ;;  %243 = vmatpush.msrb.mxu1 %v1645_v34  ;;  %2309 = vst [vmem:[#allocation14_spill] sm:$0xff] %v1680_v44  ;;  %v1794_v54 = vld [vmem:[%s2276_s3] sm:$0x3f] }
  0x19   :  { %207 = vmatpush.msra.mxu3 %v1619_v26  ;;  %324 = vmatpush.msrb.mxu2 %v1542_v2  ;;  %2310 = vst [vmem:[#allocation15_spill] sm:$0xff] %v1684_v45 }
  0x1a   :  { %226 = vmatpush.msrb.mxu0 %v1609_v23  ;;  %244 = vmatpush.msrb.mxu1 %v1656_v37  ;;  %2311 = vst [vmem:[#allocation16_spill] sm:$0xff] %v1709_v51 }
  0x1b   :  { %208 = vmatpush.msra.mxu3 %v1629_v29  ;;  %325 = vmatpush.msrb.mxu2 %v1551_v5  ;;  %2312 = vst [vmem:[#allocation17_spill] sm:$0xff] %v1715_v52 }
  0x1c   :  { %227 = vmatpush.msrb.mxu0 %v1623_v27  ;;  %245 = vmatpush.msrb.mxu1 %v1666_v40  ;;  %2313 = vst [vmem:[#allocation18_spill] sm:$0xff] %v1721_v53 }
  0x1d   :  { %209 = vmatpush.msra.mxu3 %v1639_v32  ;;  %326 = vmatpush.msrb.mxu2 %v1557_v7  ;;  %188 = vst [vmem:[#allocation1] ss:$4 sm:$0xff] %v1794_v54 }
  0x1e   :  { %228 = vmatpush.msrb.mxu0 %v1633_v30  ;;  %246 = vmatpush.msrb.mxu1 %v1676_v43 }
  0x1f   :  { %210 = vmatpush.msra.mxu3 %v1650_v35  ;;  %327 = vmatpush.msrb.mxu2 %v1563_v9 }
  0x20   :  { %229 = vmatpush.msrb.mxu0 %v1643_v33  ;;  %247 = vmatpush.msrb.mxu1 %v1689_v46 }
  0x21   :  { %211 = vmatpush.msra.mxu3 %v1660_v38  ;;  %328 = vmatpush.msrb.mxu2 %v1576_v13 }
  0x22   :  { %230 = vmatpush.msrb.mxu0 %v1654_v36  ;;  %248 = vmatpush.msrb.mxu1 %v1694_v48 }
  0x23   :  { %212 = vmatpush.msra.mxu3 %v1670_v41  ;;  %329 = vmatpush.msrb.mxu2 %v1584_v15 }
  0x24   :  { %231 = vmatpush.msrb.mxu0 %v1664_v39  ;;  %249 = vmatpush.msrb.mxu1 %v1697_v49  ;;  %v1813_v55 = vld.sshfl [vmem:[#allocation1 + $0x8] sm:$0xff pattern:$0x73625140]  ;;  %v1815_v56 = vld.sshfl [vmem:[#allocation1] sm:$0xff pattern:$0x73625140] }
  0x25   :  { %213 = vmatpush.msra.mxu3 %v1680_v44  ;;  %330 = vmatpush.msrb.mxu2 %v1590_v17  ;;  %v1819_v57 = vld.sshfl [vmem:[#allocation1 + $0x10] sm:$0xff pattern:$0x73625140] }
  0x26   :  { %232 = vmatpush.msrb.mxu0 %v1674_v42  ;;  %214 = vmatmul.f32.vlgmr.msra.gmra.mxu3 %v1502_v47  ;;  %313 = vst [vmem:[#allocation1 + $0x1] ss:$4 sm:$0xff] %v1794_v54 }
  0x27   :  { %343 = vmatpush.msrb.mxu3 %v1546_v3  ;;  %250 = vmatpush.msrb.mxu1 %v1703_v50 }
  0x28   :  { %233 = vmatpush.msrb.mxu0 %v1684_v45  ;;  %331 = vmatpush.msrb.mxu2 %v1606_v22 }
  0x29   :  { %234 = vmatmul.f32.vlgmr.msrb.gmra.mxu0 %v1502_v47  ;;  %344 = vmatpush.msrb.mxu3 %v1548_v4 }
  0x2a   :  { %363 = vmatpush.msra.mxu0 %v1597_v19  ;;  %251 = vmatpush.msrb.mxu1 %v1709_v51 }
  0x2b   :  { %345 = vmatpush.msrb.mxu3 %v1554_v6  ;;  %332 = vmatpush.msrb.mxu2 %v1619_v26 }
  0x2c   :  { %364 = vmatpush.msra.mxu0 %v1603_v21  ;;  %252 = vmatpush.msrb.mxu1 %v1715_v52 }
  0x2d   :  { %346 = vmatpush.msrb.mxu3 %v1560_v8  ;;  %333 = vmatpush.msrb.mxu2 %v1629_v29  ;;  %v1835_v58 = vld.sshfl [vmem:[#allocation1] sm:$0xff pattern:$0x73625140]  ;;  %v1837_v59 = vld.sshfl [vmem:[#allocation1 + $0x8] sm:$0xff pattern:$0x73625140] }
  0x2e   :  { %365 = vmatpush.msra.mxu0 %v1613_v24  ;;  %253 = vmatpush.msrb.mxu1 %v1721_v53  ;;  %2314 = vst [vmem:[#allocation19_spill] sm:$0xff] %v1835_v58  ;;  %v1841_v60 = vld.sshfl [vmem:[#allocation1 + $0x10] sm:$0xff pattern:$0x73625140] }
  0x2f   :  { %347 = vmatpush.msrb.mxu3 %v1569_v11  ;;  %254 = vmatmul.f32.vlgmr.msrb.gmra.mxu1 %v1502_v47  ;;  %2315 = vst [vmem:[#allocation20_spill] sm:$0xff] %v1837_v59 }
  0x30   :  { %366 = vmatpush.msra.mxu0 %v1625_v28  ;;  %334 = vmatpush.msrb.mxu2 %v1639_v32  ;;  %2316 = vst [vmem:[#allocation21_spill] sm:$0xff] %v1841_v60 }
  0x31   :  { %348 = vmatpush.msrb.mxu3 %v1580_v14  ;;  %1291 = vmatmul.msk.f32.gmra.mxu2 %vm92_vm1, %v1595_v18  ;;  %447 = vst [vmem:[#allocation1 + $0x2] ss:$4 sm:$0xff] %v1794_v54 }
  0x32   :  { %367 = vmatpush.msra.mxu0 %v1635_v31  ;;  %335 = vmatpush.msrb.mxu2 %v1650_v35 }
  0x33   :  { %349 = vmatpush.msrb.mxu3 %v1587_v16  ;;  %460 = vmatpush.msra.mxu1 %v1537_v0 }
  0x34   :  { %368 = vmatpush.msra.mxu0 %v1645_v34  ;;  %336 = vmatpush.msrb.mxu2 %v1660_v38 }
  0x35   :  { %350 = vmatpush.msrb.mxu3 %v1600_v20  ;;  %461 = vmatpush.msra.mxu1 %v1542_v2 }
  0x36   :  { %369 = vmatpush.msra.mxu0 %v1656_v37  ;;  %337 = vmatpush.msrb.mxu2 %v1670_v41 }
  0x37   :  { %351 = vmatpush.msrb.mxu3 %v1609_v23  ;;  %462 = vmatpush.msra.mxu1 %v1551_v5 }
  0x38   :  { %370 = vmatpush.msra.mxu0 %v1666_v40  ;;  %338 = vmatpush.msrb.mxu2 %v1680_v44  ;;  %v1852_v61 = vld.sshfl [vmem:[#allocation1] sm:$0xff pattern:$0x73625140]  ;;  %v1854_v62 = vld.sshfl [vmem:[#allocation1 + $0x8] sm:$0xff pattern:$0x73625140] }
  0x39   :  { %352 = vmatpush.msrb.mxu3 %v1623_v27  ;;  %463 = vmatpush.msra.mxu1 %v1557_v7  ;;  %2317 = vst [vmem:[#allocation22_spill] sm:$0xff] %v1852_v61  ;;  %v1856_v63 = vld.sshfl [vmem:[#allocation1 + $0x10] sm:$0xff pattern:$0x73625140] }
  0x3a   :  { %371 = vmatpush.msra.mxu0 %v1676_v43  ;;  %480 = vmatpush.msra.mxu2 %v1546_v3  ;;  %2318 = vst [vmem:[#allocation23_spill] sm:$0xff] %v1854_v62 }
  0x3b   :  { %353 = vmatpush.msrb.mxu3 %v1633_v30  ;;  %464 = vmatpush.msra.mxu1 %v1563_v9  ;;  %2319 = vst [vmem:[#allocation24_spill] sm:$0xff] %v1856_v63 }
  0x3c   :  { %372 = vmatpush.msra.mxu0 %v1689_v46  ;;  %481 = vmatpush.msra.mxu2 %v1548_v4  ;;  %583 = vst [vmem:[#allocation1 + $0x3] ss:$4 sm:$0xff] %v1794_v54 }
  0x3d   :  { %354 = vmatpush.msrb.mxu3 %v1643_v33  ;;  %465 = vmatpush.msra.mxu1 %v1576_v13 }
  0x3e   :  { %373 = vmatpush.msra.mxu0 %v1694_v48  ;;  %482 = vmatpush.msra.mxu2 %v1554_v6 }
  0x3f   :  { %355 = vmatpush.msrb.mxu3 %v1654_v36  ;;  %466 = vmatpush.msra.mxu1 %v1584_v15 }
  0x40   :  { %374 = vmatpush.msra.mxu0 %v1697_v49  ;;  %483 = vmatpush.msra.mxu2 %v1560_v8 }
  0x41   :  { %356 = vmatpush.msrb.mxu3 %v1664_v39  ;;  %467 = vmatpush.msra.mxu1 %v1590_v17 }
  0x42   :  { %375 = vmatpush.msra.mxu0 %v1703_v50  ;;  %484 = vmatpush.msra.mxu2 %v1569_v11 }
  0x43   :  { %357 = vmatpush.msrb.mxu3 %v1674_v42  ;;  %468 = vmatpush.msra.mxu1 %v1606_v22  ;;  %v1864_v1 = vld.sshfl [vmem:[#allocation1] sm:$0xff pattern:$0x73625140]  ;;  %v1866_v10 = vld.sshfl [vmem:[#allocation1 + $0x8] sm:$0xff pattern:$0x73625140] }
  0x44   :  { %376 = vmatpush.msra.mxu0 %v1709_v51  ;;  %485 = vmatpush.msra.mxu2 %v1580_v14  ;;  %2320 = vst [vmem:[#allocation25_spill] sm:$0xff] %v1864_v1  ;;  %v1868_v12 = vld.sshfl [vmem:[#allocation1 + $0x10] sm:$0xff pattern:$0x73625140] }
  0x45   :  { %358 = vmatpush.msrb.mxu3 %v1684_v45  ;;  %469 = vmatpush.msra.mxu1 %v1619_v26  ;;  %2321 = vst [vmem:[#allocation26_spill] sm:$0xff] %v1866_v10 }
  0x46   :  { %377 = vmatpush.msra.mxu0 %v1715_v52  ;;  %486 = vmatpush.msra.mxu2 %v1587_v16  ;;  %2322 = vst [vmem:[#allocation27_spill] sm:$0xff] %v1868_v12 }
  0x47   :  { %500 = vmatpush.msra.mxu3 %v1597_v19  ;;  %470 = vmatpush.msra.mxu1 %v1629_v29  ;;  %718 = vst [vmem:[#allocation1] ss:$4 sm:$0xff] %v1794_v54 }
  0x48   :  { %378 = vmatpush.msra.mxu0 %v1721_v53  ;;  %487 = vmatpush.msra.mxu2 %v1600_v20 }
  0x49   :  { %501 = vmatpush.msra.mxu3 %v1603_v21  ;;  %471 = vmatpush.msra.mxu1 %v1639_v32 }
  0x4a   :  { %596 = vmatpush.msrb.mxu0 %v1537_v0  ;;  %488 = vmatpush.msra.mxu2 %v1609_v23 }
  0x4b   :  { %502 = vmatpush.msra.mxu3 %v1613_v24  ;;  %472 = vmatpush.msra.mxu1 %v1650_v35 }
  0x4c   :  { %597 = vmatpush.msrb.mxu0 %v1542_v2  ;;  %489 = vmatpush.msra.mxu2 %v1623_v27 }
  0x4d   :  { %503 = vmatpush.msra.mxu3 %v1625_v28  ;;  %473 = vmatpush.msra.mxu1 %v1660_v38 }
  0x4e   :  { %598 = vmatpush.msrb.mxu0 %v1551_v5  ;;  %490 = vmatpush.msra.mxu2 %v1633_v30  ;;  %v1872_v18 = vld.sshfl [vmem:[#allocation1 + $0x8] sm:$0xff pattern:$0x73625140]  ;;  %v1874_v25 = vld.sshfl [vmem:[#allocation1] sm:$0xff pattern:$0x73625140] }
  0x4f   :  { %504 = vmatpush.msra.mxu3 %v1635_v31  ;;  %474 = vmatpush.msra.mxu1 %v1670_v41  ;;  %2323 = vst [vmem:[#allocation28_spill] sm:$0xff] %v1872_v18  ;;  %v1876_v47 = vld.sshfl [vmem:[#allocation1 + $0x10] sm:$0xff pattern:$0x73625140] }
  0x50   :  { %599 = vmatpush.msrb.mxu0 %v1557_v7  ;;  %491 = vmatpush.msra.mxu2 %v1643_v33  ;;  %2324 = vst [vmem:[#allocation29_spill] sm:$0xff] %v1874_v25 }
  0x51   :  { %505 = vmatpush.msra.mxu3 %v1645_v34  ;;  %475 = vmatpush.msra.mxu1 %v1680_v44  ;;  %2325 = vst [vmem:[#allocation30_spill] sm:$0xff] %v1876_v47 }
  0x52   :  { %600 = vmatpush.msrb.mxu0 %v1563_v9  ;;  %492 = vmatpush.msra.mxu2 %v1654_v36  ;;  %843 = vst [vmem:[#allocation1 + $0x1] ss:$4 sm:$0xff] %v1794_v54 }
  0x53   :  { %506 = vmatpush.msra.mxu3 %v1656_v37  ;;  %616 = vmatpush.msrb.mxu1 %v1546_v3 }
  0x54   :  { %601 = vmatpush.msrb.mxu0 %v1576_v13  ;;  %493 = vmatpush.msra.mxu2 %v1664_v39 }
  0x55   :  { %507 = vmatpush.msra.mxu3 %v1666_v40  ;;  %617 = vmatpush.msrb.mxu1 %v1548_v4 }
  0x56   :  { %602 = vmatpush.msrb.mxu0 %v1584_v15  ;;  %494 = vmatpush.msra.mxu2 %v1674_v42 }
  0x57   :  { %508 = vmatpush.msra.mxu3 %v1676_v43  ;;  %618 = vmatpush.msrb.mxu1 %v1554_v6 }
  0x58   :  { %603 = vmatpush.msrb.mxu0 %v1590_v17  ;;  %495 = vmatpush.msra.mxu2 %v1684_v45 }
  0x59   :  { %509 = vmatpush.msra.mxu3 %v1689_v46  ;;  %619 = vmatpush.msrb.mxu1 %v1560_v8  ;;  %v1879_v63 = vld.sshfl [vmem:[#allocation1] sm:$0xff pattern:$0x73625140]  ;;  %v1881_v62 = vld.sshfl [vmem:[#allocation1 + $0x8] sm:$0xff pattern:$0x73625140] }
  0x5a   :  { %604 = vmatpush.msrb.mxu0 %v1606_v22  ;;  %2326 = vst [vmem:[#allocation31_spill] sm:$0xff] %v1879_v63  ;;  %v1883_v1 = vld.sshfl [vmem:[#allocation1 + $0x10] sm:$0xff pattern:$0x73625140] }
  0x5b   :  { %510 = vmatpush.msra.mxu3 %v1694_v48  ;;  %620 = vmatpush.msrb.mxu1 %v1569_v11  ;;  %2327 = vst [vmem:[#allocation32_spill] sm:$0xff] %v1881_v62 }
  0x5c   :  { %605 = vmatpush.msrb.mxu0 %v1619_v26  ;;  %2328 = vst [vmem:[#allocation33_spill] sm:$0xff] %v1883_v1 }
  0x5d   :  { %511 = vmatpush.msra.mxu3 %v1697_v49  ;;  %621 = vmatpush.msrb.mxu1 %v1580_v14  ;;  %977 = vst [vmem:[#allocation1 + $0x2] ss:$4 sm:$0xff] %v1794_v54 }
  0x5e   :  { %606 = vmatpush.msrb.mxu0 %v1629_v29 }
  0x5f   :  { %512 = vmatpush.msra.mxu3 %v1703_v50  ;;  %622 = vmatpush.msrb.mxu1 %v1587_v16 }
  0x60   :  { %607 = vmatpush.msrb.mxu0 %v1639_v32 }
  0x61   :  { %513 = vmatpush.msra.mxu3 %v1709_v51  ;;  %623 = vmatpush.msrb.mxu1 %v1600_v20 }
  0x62   :  { %608 = vmatpush.msrb.mxu0 %v1650_v35 }
  0x63   :  { %514 = vmatpush.msra.mxu3 %v1715_v52  ;;  %624 = vmatpush.msrb.mxu1 %v1609_v23 }
  0x64   :  { %609 = vmatpush.msrb.mxu0 %v1660_v38  ;;  %v1886_v61 = vld.sshfl [vmem:[#allocation1] sm:$0xff pattern:$0x73625140]  ;;  %v1888_v25 = vld.sshfl [vmem:[#allocation1 + $0x8] sm:$0xff pattern:$0x73625140] }
  0x65   :  { %515 = vmatpush.msra.mxu3 %v1721_v53  ;;  %625 = vmatpush.msrb.mxu1 %v1623_v27  ;;  %2329 = vst [vmem:[#allocation34_spill] sm:$0xff] %v1886_v61  ;;  %v1890_v47 = vld.sshfl [vmem:[#allocation1 + $0x10] sm:$0xff pattern:$0x73625140] }
  0x66   :  { %610 = vmatpush.msrb.mxu0 %v1670_v41  ;;  %2330 = vst [vmem:[#allocation35_spill] sm:$0xff] %v1888_v25 }
  0x67   :  { %626 = vmatpush.msrb.mxu1 %v1633_v30  ;;  %2331 = vst [vmem:[#allocation36_spill] sm:$0xff] %v1890_v47 }
  0x68   :  { %611 = vmatpush.msrb.mxu0 %v1680_v44  ;;  %1113 = vst [vmem:[#allocation1 + $0x3] ss:$4 sm:$0xff] %v1794_v54 }
  0x69   :  { %627 = vmatpush.msrb.mxu1 %v1643_v33 }
  0x6b   :  { %628 = vmatpush.msrb.mxu1 %v1654_v36 }
  0x6d   :  { %629 = vmatpush.msrb.mxu1 %v1664_v39 }
  0x6f   :  { %630 = vmatpush.msrb.mxu1 %v1674_v42 }
  0x71   :  { %631 = vmatpush.msrb.mxu1 %v1684_v45 }
  0x88   :  { %v126_v12 = vpop.f32.mrf.mxu0 }
  0x89   :  { %178 = vst [vmem:[#allocation2 + $0x28] sm:$0xff] %v126_v12 }
  0x8a   :  { %v149_v10 = vpop.f32.mrf.mxu1 }
  0x8b   :  { %179 = vst [vmem:[#allocation2 + $0x10] sm:$0xff] %v149_v10 }
  0x90   :  { %v129_v18 = vpop.f32.mrf.mxu0  ;;  %v184_v12 = vld [vmem:[#allocation2 + $0x28] sm:$0x3] }
  0x91   :  { %181 = vst [vmem:[#allocation2] sm:$0xff] %v129_v18  ;;  %v195_v61 = vadd.f32 %v1815_v56, %v184_v12 }
  0x92   :  { %v152_v63 = vpop.f32.mrf.mxu1  ;;  %v185_v60 = vld [vmem:[#allocation2 + $0x10] sm:$0x3] }
  0x93   :  { %182 = vst [vmem:[#allocation2 + $0x18] sm:$0xff] %v152_v63  ;;  %v196_v1 = vadd.f32 %v1813_v55, %v185_v60 }
  0x94   :  { %v172_v62 = vpop.f32.mrf.mxu2 }
  0x95   :  { %180 = vst [vmem:[#allocation2 + $0x8] sm:$0xff] %v172_v62 }
  0x9c   :  { %v186_v12 = vld [vmem:[#allocation2 + $0x8] sm:$0x3] }
  0xa6   :  { %v235_v59 = vpop.f32.mrf.mxu0 }
  0xa7   :  { %v259_v10 = vadd.f32 %v235_v59, %v196_v1 }
  0xa9   :  { %v1293_v58 = vmul.f32 -1.442695, %v259_v10  ;;  %v215_v25 = vpop.f32.mrf.mxu3 }
  0xaa   :  { %v258_v45 = vadd.f32 %v215_v25, %v195_v61 }
  0xab   :  { %1314 = vpow2.f32 %v1293_v58  ;;  %v1898_v58 = vld [vmem:[%s2277_s4] ss:$0 sm:$0xff] }
  0xac   :  { %v1292_v47 = vmul.f32 -1.442695, %v258_v45  ;;  %2332 = vst [vmem:[#allocation37_spill] sm:$0xff] %v1898_v58  ;;  %v255_v45 = vpop.f32.mrf.mxu1 }
  0xae   :  { %1316 = vpow2.f32 %v1292_v47 }
  0xb1   :  { %v1315_v18 = vpop.eup %1314 }
  0xb2   :  { %v267_v54 = vadd.f32 1.0, %v1315_v18  ;;  %v301_v18 = vadd.f32 %v1898_v58, %v255_v45 }
  0xb4   :  { %1318 = vrcp.f32 %v267_v54  ;;  %v1317_v44 = vpop.eup %1316  ;;  %v175_v63 = vpop.f32.mrf.mxu2  ;;  %vm288_vm4 = vweird.f32 %v267_v54  ;;  %v294_v42 = vand.u32 2147483648, %v267_v54 }
  0xb5   :  { %v266_v53 = vadd.f32 1.0, %v1317_v44  ;;  %183 = vst [vmem:[#allocation2 + $0x20] sm:$0xff] %v175_v63 }
  0xb6   :  { %v295_v38 = vor.u32 1.1754944e-38, %v294_v42  ;;  %v2336_v42 = vld [vmem:[#allocation11_spill] sm:$0xff] }
  0xb7   :  { %1320 = vrcp.f32 %v266_v53  ;;  %v279_v61 = vand.u32 2147483648, %v266_v53  ;;  %v277_v47 = vand.u32 2147483647, %v266_v53  ;;  %vm273_vm3 = vweird.f32 %v266_v53 }
  0xb9   :  { %v280_v63 = vor.u32 1.1754944e-38, %v279_v61  ;;  %vm278_vm7 = vcmp.eq.f32.partialorder %v277_v47, 8.507059e+37  ;;  %v310_v47 = vld [vmem:[#allocation2 + $0x10] sm:$0xc] }
  0xba   :  { %v1319_v62 = vpop.eup %1318 }
  0xbb   :  { %v284_v55 = vmul.f32 %v1319_v62, %v267_v54  ;;  %vm289_vm6 = vweird.f32 %v1319_v62 }
  0xbc   :  { %vm290_vm8 = vmor %vm288_vm4, %vm289_vm6 }
  0xbd   :  { %v1321_v60 = vpop.eup %1320  ;;  %v285_v1 = vsub.f32 1.0, %v284_v55  ;;  %v197_v55 = vadd.f32 %v1819_v57, %v186_v12  ;;  %v2339_v57 = vld [vmem:[#allocation13_spill] sm:$0xff] }
  0xbe   :  { %v269_v59 = vmul.f32 %v1321_v60, %v266_v53  ;;  %vm274_vm2 = vweird.f32 %v1321_v60 }
  0xbf   :  { %v286_v44 = vmul.f32 %v1319_v62, %v285_v1  ;;  %vm275_vm5 = vmor %vm273_vm3, %vm274_vm2 }
  0xc0   :  { %v270_v56 = vsub.f32 1.0, %v269_v59 }
  0xc1   :  { %v287_v52 = vadd.f32 %v1319_v62, %v286_v44 }
  0xc2   :  { %v271_v25 = vmul.f32 %v1321_v60, %v270_v56  ;;  %v292_v56 = vand.u32 2147483647, %v267_v54  ;;  %v2340_v54 = vld [vmem:[#allocation18_spill] sm:$0xff] }
  0xc4   :  { %v272_v10 = vadd.f32 %v1321_v60, %v271_v25  ;;  %v291_v25 = vsel %vm290_vm8, %v1319_v62, %v287_v52  ;;  %vm293_vm9 = vcmp.eq.f32.partialorder %v292_v56, 8.507059e+37  ;;  %v2338_v52 = vld [vmem:[#allocation12_spill] sm:$0xff]  ;;  %v2341_v62 = vld [vmem:[#allocation14_spill] sm:$0xff] }
  0xc5   :  { %v296_v53 = vsel %vm293_vm9, %v295_v38, %v291_v25  ;;  %v2333_v38 = vld [vmem:[#allocation9_spill] sm:$0xff] }
  0xc6   :  { %v276_v59 = vsel %vm275_vm5, %v1321_v60, %v272_v10  ;;  %v305_v45 = vsub.f32 1.0, %v296_v53  ;;  %v307_v51 = vmul.f32 0.0, %v296_v53  ;;  %v2342_v60 = vld [vmem:[#allocation15_spill] sm:$0xff] }
  0xc7   :  { %v281_v41 = vsel %vm278_vm7, %v280_v63, %v276_v59  ;;  %v2343_v10 = vld [vmem:[#allocation19_spill] sm:$0xff] }
  0xc8   :  { %v302_v39 = vmul.f32 %v301_v18, %v281_v41  ;;  %v2335_v41 = vld [vmem:[#allocation10_spill] sm:$0xff] }
  0xca   :  { %v303_v1 = vadd.f32 %v302_v39, %v197_v55  ;;  %v2334_v39 = vld [vmem:[#allocation16_spill] sm:$0xff] }
  0xcb   :  { %v2344_v55 = vld [vmem:[#allocation20_spill] sm:$0xff] }
  0xcc   :  { %1322 = vtanh.f32 %v303_v1  ;;  %v321_v59 = vadd.f32 %v2344_v55, %v310_v47  ;;  %v2345_v47 = vld [vmem:[#allocation37_spill] sm:$0xff] }
  0xd2   :  { %v1323_v58 = vpop.eup %1322 }
  0xd3   :  { %v306_v61 = vmul.f32 %v1323_v58, %v305_v45  ;;  %v309_v58 = vld [vmem:[#allocation2 + $0x28] sm:$0xc] }
  0xd4   :  { %v320_v18 = vadd.f32 %v2343_v10, %v309_v58 }
  0xd5   :  { %v1902_v36 = vadd.f32 %v307_v51, %v306_v61  ;;  %v2337_v51 = vld [vmem:[#allocation17_spill] sm:$0xff] }
  0xd7   :  { %339 = vmatmul.f32.vlgmr.msrb.gmra.mxu2 %v1902_v36  ;;  %359 = vmatmul.f32.vlgmr.msrb.gmra.mxu3 %v1902_v36 }
  0xd8   :  { %379 = vmatmul.f32.vlgmr.msra.gmra.mxu0 %v1902_v36  ;;  %636 = vmatpush.msrb.mxu2 %v1597_v19 }
  0xd9   :  { %731 = vmatpush.msrb.mxu3 %v1537_v0  ;;  %751 = vmatpush.msra.mxu0 %v1546_v3 }
  0xda   :  { %637 = vmatpush.msrb.mxu2 %v1603_v21 }
  0xdb   :  { %732 = vmatpush.msrb.mxu3 %v1542_v2  ;;  %752 = vmatpush.msra.mxu0 %v1548_v4 }
  0xdc   :  { %638 = vmatpush.msrb.mxu2 %v1613_v24 }
  0xdd   :  { %733 = vmatpush.msrb.mxu3 %v1551_v5  ;;  %753 = vmatpush.msra.mxu0 %v1554_v6 }
  0xde   :  { %639 = vmatpush.msrb.mxu2 %v1625_v28 }
  0xdf   :  { %734 = vmatpush.msrb.mxu3 %v1557_v7  ;;  %754 = vmatpush.msra.mxu0 %v1560_v8 }
  0xe0   :  { %640 = vmatpush.msrb.mxu2 %v1635_v31 }
  0xe1   :  { %735 = vmatpush.msrb.mxu3 %v1563_v9  ;;  %755 = vmatpush.msra.mxu0 %v1569_v11 }
  0xe2   :  { %641 = vmatpush.msrb.mxu2 %v1645_v34 }
  0xe3   :  { %736 = vmatpush.msrb.mxu3 %v1576_v13  ;;  %756 = vmatpush.msra.mxu0 %v1580_v14 }
  0xe4   :  { %642 = vmatpush.msrb.mxu2 %v1656_v37 }
  0xe5   :  { %737 = vmatpush.msrb.mxu3 %v1584_v15  ;;  %757 = vmatpush.msra.mxu0 %v1587_v16 }
  0xe6   :  { %643 = vmatpush.msrb.mxu2 %v1666_v40 }
  0xe7   :  { %738 = vmatpush.msrb.mxu3 %v1590_v17  ;;  %758 = vmatpush.msra.mxu0 %v1600_v20 }
  0xe8   :  { %644 = vmatpush.msrb.mxu2 %v1676_v43 }
  0xe9   :  { %739 = vmatpush.msrb.mxu3 %v1606_v22  ;;  %759 = vmatpush.msra.mxu0 %v1609_v23 }
  0xea   :  { %645 = vmatpush.msrb.mxu2 %v1689_v46 }
  0xeb   :  { %740 = vmatpush.msrb.mxu3 %v1619_v26  ;;  %760 = vmatpush.msra.mxu0 %v1623_v27 }
  0xec   :  { %646 = vmatpush.msrb.mxu2 %v1694_v48 }
  0xed   :  { %741 = vmatpush.msrb.mxu3 %v1629_v29  ;;  %761 = vmatpush.msra.mxu0 %v1633_v30 }
  0xee   :  { %647 = vmatpush.msrb.mxu2 %v1697_v49 }
  0xef   :  { %742 = vmatpush.msrb.mxu3 %v1639_v32  ;;  %762 = vmatpush.msra.mxu0 %v1643_v33 }
  0xf0   :  { %648 = vmatpush.msrb.mxu2 %v1703_v50 }
  0xf1   :  { %743 = vmatpush.msrb.mxu3 %v1650_v35  ;;  %763 = vmatpush.msra.mxu0 %v2333_v38 }
  0xf2   :  { %649 = vmatpush.msrb.mxu2 %v2334_v39 }
  0xf3   :  { %744 = vmatpush.msrb.mxu3 %v2335_v41  ;;  %764 = vmatpush.msra.mxu0 %v2336_v42 }
  0xf4   :  { %650 = vmatpush.msrb.mxu2 %v2337_v51 }
  0xf5   :  { %745 = vmatpush.msrb.mxu3 %v2338_v52  ;;  %765 = vmatpush.msra.mxu0 %v2339_v57 }
  0xf6   :  { %651 = vmatpush.msrb.mxu2 %v2340_v54 }
  0xf7   :  { %746 = vmatpush.msrb.mxu3 %v2341_v62  ;;  %766 = vmatpush.msra.mxu0 %v2342_v60 }
 0x155   :  { %v380_v51 = vpop.f32.mrf.mxu0 }
 0x15a   :  { %v340_v44 = vpop.f32.mrf.mxu2  ;;  %v360_v12 = vpop.f32.mrf.mxu3 }
 0x15b   :  { %v385_v63 = vrot.slane %v340_v44, 6  ;;  %v386_v56 = vrot.slane %v360_v12, 6  ;;  %v429_v12 = vadd.f32 %v2345_v47, %v380_v51  ;;  %v439_v47 = vrot.slane %v1902_v36, 6 }
 0x15d   :  { %v389_v1 = vadd.f32 %v385_v63, %v320_v18  ;;  %v390_v25 = vadd.f32 %v386_v56, %v321_v59  ;;  %v431_v42 = vrot.slane %v429_v12, 6 }
 0x15f   :  { %v1294_v53 = vmul.f32 -1.442695, %v389_v1  ;;  %v1295_v45 = vmul.f32 -1.442695, %v390_v25 }
 0x161   :  { %1324 = vpow2.f32 %v1294_v53 }
 0x162   :  { %1326 = vpow2.f32 %v1295_v45  ;;  %v311_v45 = vld [vmem:[#allocation2 + $0x8] sm:$0xc] }
 0x167   :  { %v1325_v61 = vpop.eup %1324 }
 0x168   :  { %v1327_v62 = vpop.eup %1326  ;;  %v397_v54 = vadd.f32 1.0, %v1325_v61 }
 0x169   :  { %v398_v60 = vadd.f32 1.0, %v1327_v62 }
 0x16a   :  { %1328 = vrcp.f32 %v397_v54  ;;  %v410_v18 = vand.u32 2147483648, %v397_v54  ;;  %v408_v59 = vand.u32 2147483647, %v397_v54  ;;  %vm404_vm12 = vweird.f32 %v397_v54 }
 0x16b   :  { %1330 = vrcp.f32 %v398_v60  ;;  %v425_v56 = vand.u32 2147483648, %v398_v60  ;;  %v423_v25 = vand.u32 2147483647, %v398_v60  ;;  %vm419_vm14 = vweird.f32 %v398_v60 }
 0x16c   :  { %v411_v53 = vor.u32 1.1754944e-38, %v410_v18  ;;  %vm409_vm15 = vcmp.eq.f32.partialorder %v408_v59, 8.507059e+37 }
 0x16d   :  { %v426_v51 = vor.u32 1.1754944e-38, %v425_v56  ;;  %vm424_vm1 = vcmp.eq.f32.partialorder %v423_v25, 8.507059e+37 }
 0x170   :  { %v1329_v57 = vpop.eup %1328 }
 0x171   :  { %v1331_v52 = vpop.eup %1330  ;;  %v400_v58 = vmul.f32 %v1329_v57, %v397_v54  ;;  %vm405_vm10 = vweird.f32 %v1329_v57 }
 0x172   :  { %v415_v44 = vmul.f32 %v1331_v52, %v398_v60  ;;  %vm420_vm11 = vweird.f32 %v1331_v52  ;;  %vm406_vm13 = vmor %vm404_vm12, %vm405_vm10 }
 0x173   :  { %v401_v10 = vsub.f32 1.0, %v400_v58  ;;  %vm421_vm0 = vmor %vm419_vm14, %vm420_vm11 }
 0x174   :  { %v416_v63 = vsub.f32 1.0, %v415_v44 }
 0x175   :  { %v402_v55 = vmul.f32 %v1329_v57, %v401_v10 }
 0x176   :  { %v417_v1 = vmul.f32 %v1331_v52, %v416_v63  ;;  %v2346_v63 = vld [vmem:[#allocation21_spill] sm:$0xff] }
 0x177   :  { %v403_v62 = vadd.f32 %v1329_v57, %v402_v55  ;;  %v322_v41 = vadd.f32 %v2346_v63, %v311_v45  ;;  %v2360_v45 = vld [vmem:[#allocation24_spill] sm:$0xff] }
 0x178   :  { %v418_v61 = vadd.f32 %v1331_v52, %v417_v1 }
 0x179   :  { %v407_v58 = vsel %vm406_vm13, %v1329_v57, %v403_v62 }
 0x17a   :  { %v412_v44 = vsel %vm409_vm15, %v411_v53, %v407_v58  ;;  %v422_v10 = vsel %vm421_vm0, %v1331_v52, %v418_v61 }
 0x17b   :  { %v427_v39 = vsel %vm424_vm1, %v426_v51, %v422_v10  ;;  %v433_v55 = vmul.f32 %v431_v42, %v412_v44 }
 0x17c   :  { %v441_v54 = vmul.f32 %v439_v47, %v427_v39  ;;  %v436_v60 = vsub.f32 1.0, %v427_v39  ;;  %v2359_v39 = vld [vmem:[#allocation37_spill] sm:$0xff]  ;;  %v445_v47 = vld [vmem:[#allocation2 + $0x8] sm:$0x30] }
 0x17d   :  { %v434_v38 = vadd.f32 %v433_v55, %v322_v41  ;;  %v456_v61 = vadd.f32 %v2360_v45, %v445_v47  ;;  %v2123_v47 = vld [vmem:[#allocation3 + $0x50] sm:$0xff] }
 0x17f   :  { %1332 = vtanh.f32 %v434_v38 }
 0x185   :  { %v1333_v18 = vpop.eup %1332 }
 0x186   :  { %v437_v1 = vmul.f32 %v1333_v18, %v436_v60 }
 0x188   :  { %v1960_v12 = vadd.f32 %v441_v54, %v437_v1 }
 0x18a   :  { %v458_v57 = vrot.slane %v1960_v12, 2  ;;  %v575_v18 = vrot.slane %v1960_v12, 6  ;;  %v2022_v12 = vld [vmem:[#allocation3 + $0x168] sm:$0xff] }
 0x18c   :  { %476 = vmatmul.f32.vlgmr.msra.gmra.mxu1 %v458_v57  ;;  %496 = vmatmul.f32.vlgmr.msra.gmra.mxu2 %v458_v57 }
 0x18d   :  { %516 = vmatmul.f32.vlgmr.msra.gmra.mxu3 %v458_v57  ;;  %771 = vmatpush.msra.mxu1 %v1597_v19 }
 0x18e   :  { %853 = vmatpush.msra.mxu2 %v1537_v0  ;;  %873 = vmatpush.msra.mxu3 %v1546_v3  ;;  %v2347_v0 = vld [vmem:[#allocation9_spill] sm:$0xff]  ;;  %v2349_v3 = vld [vmem:[#allocation10_spill] sm:$0xff] }
 0x18f   :  { %772 = vmatpush.msra.mxu1 %v1603_v21 }
 0x190   :  { %854 = vmatpush.msra.mxu2 %v1542_v2  ;;  %874 = vmatpush.msra.mxu3 %v1548_v4  ;;  %v2348_v2 = vld [vmem:[#allocation16_spill] sm:$0xff]  ;;  %v2350_v4 = vld [vmem:[#allocation11_spill] sm:$0xff] }
 0x191   :  { %773 = vmatpush.msra.mxu1 %v1613_v24 }
 0x192   :  { %855 = vmatpush.msra.mxu2 %v1551_v5  ;;  %875 = vmatpush.msra.mxu3 %v1554_v6  ;;  %v2351_v5 = vld [vmem:[#allocation17_spill] sm:$0xff]  ;;  %v2352_v6 = vld [vmem:[#allocation12_spill] sm:$0xff] }
 0x193   :  { %774 = vmatpush.msra.mxu1 %v1625_v28 }
 0x194   :  { %856 = vmatpush.msra.mxu2 %v1557_v7  ;;  %876 = vmatpush.msra.mxu3 %v1560_v8  ;;  %v2353_v7 = vld [vmem:[#allocation13_spill] sm:$0xff]  ;;  %v2354_v8 = vld [vmem:[#allocation18_spill] sm:$0xff] }
 0x195   :  { %775 = vmatpush.msra.mxu1 %v1635_v31 }
 0x196   :  { %857 = vmatpush.msra.mxu2 %v1563_v9  ;;  %877 = vmatpush.msra.mxu3 %v1569_v11  ;;  %v2355_v9 = vld [vmem:[#allocation14_spill] sm:$0xff]  ;;  %v2356_v11 = vld [vmem:[#allocation15_spill] sm:$0xff] }
 0x197   :  { %776 = vmatpush.msra.mxu1 %v1645_v34 }
 0x198   :  { %858 = vmatpush.msra.mxu2 %v1576_v13  ;;  %878 = vmatpush.msra.mxu3 %v1580_v14  ;;  %v443_v13 = vld [vmem:[#allocation2 + $0x28] sm:$0x30] }
 0x199   :  { %777 = vmatpush.msra.mxu1 %v1656_v37 }
 0x19a   :  { %859 = vmatpush.msra.mxu2 %v1584_v15  ;;  %879 = vmatpush.msra.mxu3 %v1587_v16  ;;  %v2357_v15 = vld [vmem:[#allocation22_spill] sm:$0xff] }
 0x19b   :  { %778 = vmatpush.msra.mxu1 %v1666_v40  ;;  %v454_v16 = vadd.f32 %v2357_v15, %v443_v13  ;;  %v2025_v13 = vld [vmem:[#allocation3 + $0x170] sm:$0xff] }
 0x19c   :  { %860 = vmatpush.msra.mxu2 %v1590_v17  ;;  %880 = vmatpush.msra.mxu3 %v1600_v20  ;;  %v444_v20 = vld [vmem:[#allocation2 + $0x10] sm:$0x30]  ;;  %v2031_v15 = vld [vmem:[#allocation3 + $0x150] sm:$0xff] }
 0x19d   :  { %779 = vmatpush.msra.mxu1 %v1676_v43 }
 0x19e   :  { %861 = vmatpush.msra.mxu2 %v1606_v22  ;;  %881 = vmatpush.msra.mxu3 %v1609_v23  ;;  %v2358_v23 = vld [vmem:[#allocation23_spill] sm:$0xff] }
 0x19f   :  { %780 = vmatpush.msra.mxu1 %v1689_v46  ;;  %v455_v24 = vadd.f32 %v2358_v23, %v444_v20  ;;  %v2043_v20 = vld [vmem:[#allocation3 + $0x140] sm:$0xff]  ;;  %v2052_v23 = vld [vmem:[#allocation3 + $0x128] sm:$0xff] }
 0x1a0   :  { %862 = vmatpush.msra.mxu2 %v1619_v26  ;;  %882 = vmatpush.msra.mxu3 %v1623_v27 }
 0x1a1   :  { %781 = vmatpush.msra.mxu1 %v1694_v48 }
 0x1a2   :  { %863 = vmatpush.msra.mxu2 %v1629_v29  ;;  %883 = vmatpush.msra.mxu3 %v1633_v30 }
 0x1a3   :  { %782 = vmatpush.msra.mxu1 %v1697_v49 }
 0x1a4   :  { %864 = vmatpush.msra.mxu2 %v1639_v32  ;;  %884 = vmatpush.msra.mxu3 %v1643_v33 }
 0x1a5   :  { %783 = vmatpush.msra.mxu1 %v1703_v50 }
 0x1a6   :  { %865 = vmatpush.msra.mxu2 %v1650_v35  ;;  %885 = vmatpush.msra.mxu3 %v2347_v0 }
 0x1a7   :  { %784 = vmatpush.msra.mxu1 %v2348_v2 }
 0x1a8   :  { %866 = vmatpush.msra.mxu2 %v2349_v3  ;;  %886 = vmatpush.msra.mxu3 %v2350_v4 }
 0x1a9   :  { %785 = vmatpush.msra.mxu1 %v2351_v5 }
 0x1aa   :  { %867 = vmatpush.msra.mxu2 %v2352_v6  ;;  %887 = vmatpush.msra.mxu3 %v2353_v7 }
 0x1ab   :  { %786 = vmatpush.msra.mxu1 %v2354_v8 }
 0x1ac   :  { %868 = vmatpush.msra.mxu2 %v2355_v9  ;;  %888 = vmatpush.msra.mxu3 %v2356_v11  ;;  %v2019_v11 = vld [vmem:[#allocation3 + $0x178] sm:$0xff] }
 0x209   :  { %v477_v14 = vpop.f32.mrf.mxu1 }
 0x20a   :  { %v522_v17 = vrot.slane %v477_v14, 4  ;;  %v2028_v14 = vld [vmem:[#allocation3 + $0x160] sm:$0xff] }
 0x20c   :  { %v526_v19 = vadd.f32 %v522_v17, %v454_v16  ;;  %v2034_v16 = vld [vmem:[#allocation3 + $0x158] sm:$0xff]  ;;  %v2037_v17 = vld [vmem:[#allocation3 + $0x148] sm:$0xff] }
 0x20e   :  { %v1296_v21 = vmul.f32 -1.442695, %v526_v19  ;;  %v2040_v19 = vld [vmem:[#allocation3 + $0x138] sm:$0xff] }
 0x20f   :  { %v497_v22 = vpop.f32.mrf.mxu2 }
 0x210   :  { %1334 = vpow2.f32 %v1296_v21  ;;  %v523_v26 = vrot.slane %v497_v22, 4  ;;  %v517_v35 = vpop.f32.mrf.mxu3  ;;  %v2046_v21 = vld [vmem:[#allocation3 + $0x130] sm:$0xff]  ;;  %v2049_v22 = vld [vmem:[#allocation3 + $0x120] sm:$0xff] }
 0x211   :  { %v566_v41 = vadd.f32 %v2359_v39, %v517_v35  ;;  %v2085_v35 = vld [vmem:[#allocation3 + $0xc0] sm:$0xff] }
 0x212   :  { %v527_v27 = vadd.f32 %v523_v26, %v455_v24  ;;  %v2055_v24 = vld [vmem:[#allocation3 + $0x118] sm:$0xff]  ;;  %v2058_v26 = vld [vmem:[#allocation3 + $0x108] sm:$0xff] }
 0x213   :  { %v568_v53 = vrot.slane %v566_v41, 4  ;;  %v2102_v41 = vld [vmem:[#allocation3 + $0x98] sm:$0xff] }
 0x214   :  { %v1297_v28 = vmul.f32 -1.442695, %v527_v27  ;;  %v2061_v27 = vld [vmem:[#allocation3 + $0x110] sm:$0xff] }
 0x216   :  { %v1335_v29 = vpop.eup %1334  ;;  %1336 = vpow2.f32 %v1297_v28  ;;  %v2064_v28 = vld [vmem:[#allocation3 + $0x100] sm:$0xff] }
 0x217   :  { %v534_v30 = vadd.f32 1.0, %v1335_v29  ;;  %v2067_v29 = vld [vmem:[#allocation3 + $0xf0] sm:$0xff] }
 0x219   :  { %1338 = vrcp.f32 %v534_v30  ;;  %v547_v37 = vand.u32 2147483648, %v534_v30  ;;  %v545_v38 = vand.u32 2147483647, %v534_v30  ;;  %vm541_vm3 = vweird.f32 %v534_v30 }
 0x21b   :  { %v548_v56 = vor.u32 1.1754944e-38, %v547_v37  ;;  %vm546_vm5 = vcmp.eq.f32.partialorder %v545_v38, 8.507059e+37  ;;  %v2092_v37 = vld [vmem:[#allocation3 + $0xa8] sm:$0xff]  ;;  %v2099_v38 = vld [vmem:[#allocation3 + $0x90] sm:$0xff] }
 0x21c   :  { %v1337_v31 = vpop.eup %1336 }
 0x21d   :  { %v535_v32 = vadd.f32 1.0, %v1337_v31  ;;  %v2073_v31 = vld [vmem:[#allocation3 + $0xe8] sm:$0xff] }
 0x21f   :  { %v1339_v33 = vpop.eup %1338  ;;  %1340 = vrcp.f32 %v535_v32  ;;  %v562_v51 = vand.u32 2147483648, %v535_v32  ;;  %v560_v63 = vand.u32 2147483647, %v535_v32  ;;  %vm556_vm7 = vweird.f32 %v535_v32 }
 0x220   :  { %v537_v34 = vmul.f32 %v1339_v33, %v534_v30  ;;  %vm542_vm2 = vweird.f32 %v1339_v33  ;;  %v2070_v30 = vld [vmem:[#allocation3 + $0xf8] sm:$0xff] }
 0x221   :  { %vm543_vm4 = vmor %vm541_vm3, %vm542_vm2  ;;  %v563_v60 = vor.u32 1.1754944e-38, %v562_v51  ;;  %vm561_vm9 = vcmp.eq.f32.partialorder %v560_v63, 8.507059e+37 }
 0x222   :  { %v538_v36 = vsub.f32 1.0, %v537_v34  ;;  %v2082_v34 = vld [vmem:[#allocation3 + $0xd0] sm:$0xff] }
 0x224   :  { %v539_v40 = vmul.f32 %v1339_v33, %v538_v36  ;;  %v2088_v36 = vld [vmem:[#allocation3 + $0xc8] sm:$0xff] }
 0x225   :  { %v1341_v42 = vpop.eup %1340 }
 0x226   :  { %v552_v52 = vmul.f32 %v1341_v42, %v535_v32  ;;  %v540_v59 = vadd.f32 %v1339_v33, %v539_v40  ;;  %vm557_vm6 = vweird.f32 %v1341_v42  ;;  %v2076_v32 = vld [vmem:[#allocation3 + $0xd8] sm:$0xff]  ;;  %v2095_v40 = vld [vmem:[#allocation3 + $0xb0] sm:$0xff] }
 0x227   :  { %vm558_vm8 = vmor %vm556_vm7, %vm557_vm6 }
 0x228   :  { %v553_v25 = vsub.f32 1.0, %v552_v52  ;;  %v544_v62 = vsel %vm543_vm4, %v1339_v33, %v540_v59  ;;  %v2079_v33 = vld [vmem:[#allocation3 + $0xe0] sm:$0xff]  ;;  %v2116_v52 = vld [vmem:[#allocation3 + $0x68] sm:$0xff]  ;;  %v2130_v59 = vld [vmem:[#allocation3 + $0x38] sm:$0xff] }
 0x229   :  { %v549_v58 = vsel %vm546_vm5, %v548_v56, %v544_v62  ;;  %v2137_v56 = vld [vmem:[#allocation3 + $0x20] sm:$0xff]  ;;  %v579_v62 = vld [vmem:[#allocation2 + $0x28] sm:$0xc0] }
 0x22a   :  { %v554_v44 = vmul.f32 %v1341_v42, %v553_v25  ;;  %v570_v10 = vmul.f32 %v568_v53, %v549_v58  ;;  %v2144_v25 = vld [vmem:[#allocation3 + $0x8] sm:$0xff] }
 0x22b   :  { %2362 = vst [vmem:[#allocation20_spill] sm:$0xff] %v2144_v25 }
 0x22c   :  { %v571_v55 = vadd.f32 %v570_v10, %v456_v61  ;;  %v555_v54 = vadd.f32 %v1341_v42, %v554_v44  ;;  %v2363_v61 = vld [vmem:[#allocation25_spill] sm:$0xff]  ;;  %v2364_v44 = vld [vmem:[#allocation26_spill] sm:$0xff] }
 0x22d   :  { %v590_v58 = vadd.f32 %v2363_v61, %v579_v62 }
 0x22e   :  { %1342 = vtanh.f32 %v571_v55  ;;  %v559_v1 = vsel %vm558_vm8, %v1341_v42, %v555_v54  ;;  %v2109_v42 = vld [vmem:[#allocation3 + $0x80] sm:$0xff] }
 0x22f   :  { %v564_v57 = vsel %vm561_vm9, %v563_v60, %v559_v1 }
 0x230   :  { %v577_v0 = vmul.f32 %v575_v18, %v564_v57  ;;  %v573_v3 = vsub.f32 1.0, %v564_v57 }
 0x234   :  { %v1343_v4 = vpop.eup %1342 }
 0x235   :  { %v574_v6 = vmul.f32 %v1343_v4, %v573_v3 }
 0x237   :  { %v2016_v7 = vadd.f32 %v577_v0, %v574_v6 }
 0x239   :  { %v594_v9 = vrot.slane %v2016_v7, 4 }
 0x23b   :  { %612 = vmatmul.f32.vlgmr.msrb.gmra.mxu0 %v594_v9  ;;  %632 = vmatmul.f32.vlgmr.msrb.gmra.mxu1 %v594_v9 }
 0x23c   :  { %652 = vmatmul.f32.vlgmr.msrb.gmra.mxu2 %v594_v9  ;;  %893 = vmatpush.msrb.mxu0 %v2019_v11 }
 0x23d   :  { %990 = vmatpush.msrb.mxu1 %v2022_v12  ;;  %1010 = vmatpush.msrb.mxu2 %v2025_v13 }
 0x23e   :  { %894 = vmatpush.msrb.mxu0 %v2028_v14 }
 0x23f   :  { %991 = vmatpush.msrb.mxu1 %v2031_v15  ;;  %1011 = vmatpush.msrb.mxu2 %v2034_v16 }
 0x240   :  { %895 = vmatpush.msrb.mxu0 %v2037_v17 }
 0x241   :  { %992 = vmatpush.msrb.mxu1 %v2040_v19  ;;  %1012 = vmatpush.msrb.mxu2 %v2043_v20 }
 0x242   :  { %896 = vmatpush.msrb.mxu0 %v2046_v21 }
 0x243   :  { %993 = vmatpush.msrb.mxu1 %v2049_v22  ;;  %1013 = vmatpush.msrb.mxu2 %v2052_v23 }
 0x244   :  { %897 = vmatpush.msrb.mxu0 %v2055_v24 }
 0x245   :  { %994 = vmatpush.msrb.mxu1 %v2058_v26  ;;  %1014 = vmatpush.msrb.mxu2 %v2061_v27 }
 0x246   :  { %898 = vmatpush.msrb.mxu0 %v2064_v28 }
 0x247   :  { %995 = vmatpush.msrb.mxu1 %v2067_v29  ;;  %1015 = vmatpush.msrb.mxu2 %v2070_v30 }
 0x248   :  { %899 = vmatpush.msrb.mxu0 %v2073_v31 }
 0x249   :  { %996 = vmatpush.msrb.mxu1 %v2076_v32  ;;  %1016 = vmatpush.msrb.mxu2 %v2079_v33 }
 0x24a   :  { %900 = vmatpush.msrb.mxu0 %v2082_v34 }
 0x24b   :  { %997 = vmatpush.msrb.mxu1 %v2085_v35  ;;  %1017 = vmatpush.msrb.mxu2 %v2088_v36 }
 0x24c   :  { %901 = vmatpush.msrb.mxu0 %v1676_v43  ;;  %v2106_v43 = vld [vmem:[#allocation3 + $0x78] sm:$0xff] }
 0x24d   :  { %998 = vmatpush.msrb.mxu1 %v2092_v37  ;;  %1018 = vmatpush.msrb.mxu2 %v2095_v40 }
 0x24e   :  { %902 = vmatpush.msrb.mxu0 %v1689_v46  ;;  %v2113_v46 = vld [vmem:[#allocation3 + $0x60] sm:$0xff] }
 0x24f   :  { %999 = vmatpush.msrb.mxu1 %v2099_v38  ;;  %1019 = vmatpush.msrb.mxu2 %v2102_v41 }
 0x250   :  { %903 = vmatpush.msrb.mxu0 %v1694_v48  ;;  %v2120_v48 = vld [vmem:[#allocation3 + $0x48] sm:$0xff] }
 0x251   :  { %1000 = vmatpush.msrb.mxu1 %v2106_v43  ;;  %1020 = vmatpush.msrb.mxu2 %v2109_v42 }
 0x252   :  { %904 = vmatpush.msrb.mxu0 %v1697_v49  ;;  %v2127_v49 = vld [vmem:[#allocation3 + $0x30] sm:$0xff] }
 0x253   :  { %1001 = vmatpush.msrb.mxu1 %v2113_v46  ;;  %1021 = vmatpush.msrb.mxu2 %v2116_v52 }
 0x254   :  { %905 = vmatpush.msrb.mxu0 %v1703_v50  ;;  %v2134_v50 = vld [vmem:[#allocation3 + $0x18] sm:$0xff] }
 0x255   :  { %1002 = vmatpush.msrb.mxu1 %v2120_v48  ;;  %1022 = vmatpush.msrb.mxu2 %v2123_v47 }
 0x256   :  { %906 = vmatpush.msrb.mxu0 %v2348_v2  ;;  %v2141_v2 = vld [vmem:[#allocation3] sm:$0xff] }
 0x257   :  { %1003 = vmatpush.msrb.mxu1 %v2127_v49  ;;  %1023 = vmatpush.msrb.mxu2 %v2130_v59  ;;  %2361 = vst [vmem:[#allocation19_spill] sm:$0xff] %v2141_v2 }
 0x258   :  { %907 = vmatpush.msrb.mxu0 %v2351_v5  ;;  %v580_v5 = vld [vmem:[#allocation2 + $0x10] sm:$0xc0] }
 0x259   :  { %1004 = vmatpush.msrb.mxu1 %v2134_v50  ;;  %1024 = vmatpush.msrb.mxu2 %v2137_v56  ;;  %v591_v10 = vadd.f32 %v2364_v44, %v580_v5 }
 0x25a   :  { %908 = vmatpush.msrb.mxu0 %v2354_v8 }
 0x25b   :  { %1005 = vmatpush.msrb.mxu1 %v2141_v2  ;;  %1025 = vmatpush.msrb.mxu2 %v2144_v25 }
 0x2b8   :  { %v613_v53 = vpop.f32.mrf.mxu0  ;;  %v633_v45 = vpop.f32.mrf.mxu1 }
 0x2b9   :  { %v658_v51 = vrot.slane %v613_v53, 2  ;;  %v659_v63 = vrot.slane %v633_v45, 2 }
 0x2bb   :  { %v662_v55 = vadd.f32 %v658_v51, %v590_v58  ;;  %v663_v8 = vadd.f32 %v659_v63, %v591_v10 }
 0x2bd   :  { %v1298_v54 = vmul.f32 -1.442695, %v662_v55  ;;  %v1299_v60 = vmul.f32 -1.442695, %v663_v8  ;;  %v581_v8 = vld [vmem:[#allocation2 + $0x8] sm:$0xc0] }
 0x2bf   :  { %1344 = vpow2.f32 %v1298_v54  ;;  %v653_v6 = vpop.f32.mrf.mxu2 }
 0x2c0   :  { %1346 = vpow2.f32 %v1299_v60  ;;  %v702_v61 = vadd.f32 %v2359_v39, %v653_v6  ;;  %v711_v6 = vrot.slane %v2016_v7, 6  ;;  %v2186_v7 = vld [vmem:[#allocation3 + $0xa0] sm:$0xff] }
 0x2c5   :  { %v1345_v18 = vpop.eup %1344 }
 0x2c6   :  { %v1347_v1 = vpop.eup %1346  ;;  %v670_v57 = vadd.f32 1.0, %v1345_v18 }
 0x2c7   :  { %v671_v0 = vadd.f32 1.0, %v1347_v1  ;;  %v704_v1 = vrot.slane %v702_v61, 2 }
 0x2c8   :  { %1348 = vrcp.f32 %v670_v57  ;;  %v683_v45 = vand.u32 2147483648, %v670_v57  ;;  %v681_v51 = vand.u32 2147483647, %v670_v57  ;;  %vm677_vm12 = vweird.f32 %v670_v57 }
 0x2c9   :  { %1350 = vrcp.f32 %v671_v0  ;;  %v698_v44 = vand.u32 2147483648, %v671_v0  ;;  %v696_v63 = vand.u32 2147483647, %v671_v0  ;;  %vm692_vm14 = vweird.f32 %v671_v0 }
 0x2ca   :  { %v684_v54 = vor.u32 1.1754944e-38, %v683_v45  ;;  %vm682_vm15 = vcmp.eq.f32.partialorder %v681_v51, 8.507059e+37 }
 0x2cb   :  { %vm697_vm1 = vcmp.eq.f32.partialorder %v696_v63, 8.507059e+37 }
 0x2ce   :  { %v1349_v3 = vpop.eup %1348 }
 0x2cf   :  { %v1351_v4 = vpop.eup %1350  ;;  %v673_v9 = vmul.f32 %v1349_v3, %v670_v57  ;;  %vm678_vm10 = vweird.f32 %v1349_v3 }
 0x2d0   :  { %v688_v62 = vmul.f32 %v1351_v4, %v671_v0  ;;  %vm693_vm11 = vweird.f32 %v1351_v4  ;;  %vm679_vm13 = vmor %vm677_vm12, %vm678_vm10 }
 0x2d1   :  { %v674_v53 = vsub.f32 1.0, %v673_v9  ;;  %vm694_vm0 = vmor %vm692_vm14, %vm693_vm11  ;;  %v699_v9 = vor.u32 1.1754944e-38, %v698_v44 }
 0x2d2   :  { %v689_v5 = vsub.f32 1.0, %v688_v62 }
 0x2d3   :  { %v675_v58 = vmul.f32 %v1349_v3, %v674_v53 }
 0x2d4   :  { %v690_v10 = vmul.f32 %v1351_v4, %v689_v5  ;;  %v2365_v5 = vld [vmem:[#allocation27_spill] sm:$0xff] }
 0x2d5   :  { %v676_v55 = vadd.f32 %v1349_v3, %v675_v58  ;;  %v592_v39 = vadd.f32 %v2365_v5, %v581_v8  ;;  %v717_v8 = vld [vmem:[#allocation2 + $0x20] sm:$0x3] }
 0x2d6   :  { %v691_v60 = vadd.f32 %v1351_v4, %v690_v10 }
 0x2d7   :  { %v680_v18 = vsel %vm679_vm13, %v1349_v3, %v676_v55 }
 0x2d8   :  { %v685_v62 = vsel %vm682_vm15, %v684_v54, %v680_v18  ;;  %v695_v53 = vsel %vm694_vm0, %v1351_v4, %v691_v60  ;;  %v2370_v54 = vld [vmem:[#allocation37_spill] sm:$0xff] }
 0x2d9   :  { %v706_v25 = vmul.f32 %v704_v1, %v685_v62  ;;  %v700_v58 = vsel %vm697_vm1, %v699_v9, %v695_v53 }
 0x2da   :  { %v713_v57 = vmul.f32 %v711_v6, %v700_v58  ;;  %v709_v45 = vsub.f32 1.0, %v700_v58  ;;  %v2371_v6 = vld [vmem:[#allocation30_spill] sm:$0xff] }
 0x2db   :  { %v707_v2 = vadd.f32 %v706_v25, %v592_v39  ;;  %v2181_v39 = vld [vmem:[#allocation3 + $0xb8] sm:$0xff]  ;;  %v727_v62 = vadd.f32 %v2371_v6, %v717_v8 }
 0x2dd   :  { %1352 = vtanh.f32 %v707_v2 }
 0x2e3   :  { %v1353_v10 = vpop.eup %1352 }
 0x2e4   :  { %v710_v0 = vmul.f32 %v1353_v10, %v709_v45 }
 0x2e6   :  { %v714_v3 = vadd.f32 %v713_v57, %v710_v0 }
 0x2e8   :  { %v2152_v51 = vrot.slane %v714_v3, 6 }
 0x2ea   :  { %747 = vmatmul.f32.vlgmr.msrb.gmra.mxu3 %v2152_v51  ;;  %767 = vmatmul.f32.vlgmr.msra.gmra.mxu0 %v2152_v51 }
 0x2eb   :  { %787 = vmatmul.f32.vlgmr.msra.gmra.mxu1 %v2152_v51  ;;  %1030 = vmatpush.msrb.mxu3 %v2019_v11 }
 0x2ec   :  { %1126 = vmatpush.msra.mxu0 %v2022_v12  ;;  %1146 = vmatpush.msra.mxu1 %v2025_v13  ;;  %v2191_v12 = vld [vmem:[#allocation3 + $0x88] sm:$0xff]  ;;  %v2196_v13 = vld [vmem:[#allocation3 + $0x70] sm:$0xff] }
 0x2ed   :  { %1031 = vmatpush.msrb.mxu3 %v2028_v14 }
 0x2ee   :  { %1127 = vmatpush.msra.mxu0 %v2031_v15  ;;  %1147 = vmatpush.msra.mxu1 %v2034_v16  ;;  %v2201_v15 = vld [vmem:[#allocation3 + $0x58] sm:$0xff]  ;;  %v2206_v16 = vld [vmem:[#allocation3 + $0x40] sm:$0xff] }
 0x2ef   :  { %1032 = vmatpush.msrb.mxu3 %v2037_v17 }
 0x2f0   :  { %1128 = vmatpush.msra.mxu0 %v2040_v19  ;;  %1148 = vmatpush.msra.mxu1 %v2043_v20  ;;  %v2211_v19 = vld [vmem:[#allocation3 + $0x28] sm:$0xff]  ;;  %v2216_v20 = vld [vmem:[#allocation3 + $0x10] sm:$0xff] }
 0x2f1   :  { %1033 = vmatpush.msrb.mxu3 %v2046_v21 }
 0x2f2   :  { %1129 = vmatpush.msra.mxu0 %v2049_v22  ;;  %1149 = vmatpush.msra.mxu1 %v2052_v23  ;;  %v2366_v22 = vld [vmem:[#allocation19_spill] sm:$0xff]  ;;  %v2367_v23 = vld [vmem:[#allocation20_spill] sm:$0xff] }
 0x2f3   :  { %1034 = vmatpush.msrb.mxu3 %v2055_v24 }
 0x2f4   :  { %1130 = vmatpush.msra.mxu0 %v2058_v26  ;;  %1150 = vmatpush.msra.mxu1 %v2061_v27  ;;  %v716_v26 = vld [vmem:[#allocation2 + $0x18] sm:$0x3]  ;;  %v2368_v27 = vld [vmem:[#allocation28_spill] sm:$0xff] }
 0x2f5   :  { %1035 = vmatpush.msrb.mxu3 %v2064_v28 }
 0x2f6   :  { %1131 = vmatpush.msra.mxu0 %v2067_v29  ;;  %1151 = vmatpush.msra.mxu1 %v2070_v30  ;;  %v726_v29 = vadd.f32 %v2368_v27, %v716_v26 }
 0x2f7   :  { %1036 = vmatpush.msrb.mxu3 %v2073_v31 }
 0x2f8   :  { %1132 = vmatpush.msra.mxu0 %v2076_v32  ;;  %1152 = vmatpush.msra.mxu1 %v2079_v33  ;;  %v715_v33 = vld [vmem:[#allocation2] sm:$0x3] }
 0x2f9   :  { %1037 = vmatpush.msrb.mxu3 %v2082_v34 }
 0x2fa   :  { %1133 = vmatpush.msra.mxu0 %v2085_v35  ;;  %1153 = vmatpush.msra.mxu1 %v2088_v36  ;;  %v2369_v36 = vld [vmem:[#allocation29_spill] sm:$0xff] }
 0x2fb   :  { %1038 = vmatpush.msrb.mxu3 %v2181_v39 }
 0x2fc   :  { %1134 = vmatpush.msra.mxu0 %v2092_v37  ;;  %1154 = vmatpush.msra.mxu1 %v2095_v40  ;;  %v725_v37 = vadd.f32 %v2369_v36, %v715_v33 }
 0x2fd   :  { %1039 = vmatpush.msrb.mxu3 %v2186_v7 }
 0x2fe   :  { %1135 = vmatpush.msra.mxu0 %v2099_v38  ;;  %1155 = vmatpush.msra.mxu1 %v2102_v41 }
 0x2ff   :  { %1040 = vmatpush.msrb.mxu3 %v2191_v12 }
 0x300   :  { %1136 = vmatpush.msra.mxu0 %v2106_v43  ;;  %1156 = vmatpush.msra.mxu1 %v2109_v42 }
 0x301   :  { %1041 = vmatpush.msrb.mxu3 %v2196_v13 }
 0x302   :  { %1137 = vmatpush.msra.mxu0 %v2113_v46  ;;  %1157 = vmatpush.msra.mxu1 %v2116_v52 }
 0x303   :  { %1042 = vmatpush.msrb.mxu3 %v2201_v15 }
 0x304   :  { %1138 = vmatpush.msra.mxu0 %v2120_v48  ;;  %1158 = vmatpush.msra.mxu1 %v2123_v47 }
 0x305   :  { %1043 = vmatpush.msrb.mxu3 %v2206_v16 }
 0x306   :  { %1139 = vmatpush.msra.mxu0 %v2127_v49  ;;  %1159 = vmatpush.msra.mxu1 %v2130_v59 }
 0x307   :  { %1044 = vmatpush.msrb.mxu3 %v2211_v19 }
 0x308   :  { %1140 = vmatpush.msra.mxu0 %v2134_v50  ;;  %1160 = vmatpush.msra.mxu1 %v2137_v56 }
 0x309   :  { %1045 = vmatpush.msrb.mxu3 %v2216_v20 }
 0x30a   :  { %1141 = vmatpush.msra.mxu0 %v2366_v22  ;;  %1161 = vmatpush.msra.mxu1 %v2367_v23 }
 0x367   :  { %v768_v30 = vpop.f32.mrf.mxu0 }
 0x368   :  { %v792_v32 = vadd.f32 %v768_v30, %v726_v29  ;;  %v788_v44 = vpop.f32.mrf.mxu1 }
 0x369   :  { %v831_v60 = vadd.f32 %v2370_v54, %v788_v44 }
 0x36a   :  { %v1301_v35 = vmul.f32 -1.442695, %v792_v32 }
 0x36c   :  { %1354 = vpow2.f32 %v1301_v35 }
 0x36d   :  { %v748_v40 = vpop.f32.mrf.mxu3 }
 0x36e   :  { %v791_v38 = vadd.f32 %v748_v40, %v725_v37  ;;  %v2252_v40 = vld [vmem:[%s2277_s4] ss:$0 sm:$0xff]  ;;  %s1503_s4 = smov [#allocation6]  }
 0x36f   :  { %s1271_s12 = sshll.u32 %s1503_s4, 4  ;;  %s1272_s12 = int_to_ptr.vmem [resolvable:$true] %s1271_s12 }
 0x370   :  { %v1300_v41 = vmul.f32 -1.442695, %v791_v38 }
 0x372   :  { %v1355_v43 = vpop.eup %1354  ;;  %1356 = vpow2.f32 %v1300_v41 }
 0x373   :  { %v800_v42 = vadd.f32 1.0, %v1355_v43 }
 0x375   :  { %1358 = vrcp.f32 %v800_v42  ;;  %v827_v53 = vand.u32 2147483648, %v800_v42  ;;  %vm821_vm7 = vweird.f32 %v800_v42  ;;  %v825_v58 = vand.u32 2147483647, %v800_v42 }
 0x377   :  { %v828_v10 = vor.u32 1.1754944e-38, %v827_v53  ;;  %vm826_vm9 = vcmp.eq.f32.partialorder %v825_v58, 8.507059e+37  ;;  %v973_v58 = vld [vmem:[#allocation2] sm:$0x30] }
 0x378   :  { %v1357_v46 = vpop.eup %1356 }
 0x379   :  { %v799_v52 = vadd.f32 1.0, %v1357_v46 }
 0x37b   :  { %1360 = vrcp.f32 %v799_v52  ;;  %v1359_v48 = vpop.eup %1358  ;;  %v812_v2 = vand.u32 2147483648, %v799_v52  ;;  %v810_v4 = vand.u32 2147483647, %v799_v52  ;;  %vm806_vm3 = vweird.f32 %v799_v52 }
 0x37c   :  { %v817_v47 = vmul.f32 %v1359_v48, %v800_v42  ;;  %vm822_vm6 = vweird.f32 %v1359_v48 }
 0x37d   :  { %v813_v55 = vor.u32 1.1754944e-38, %v812_v2  ;;  %vm811_vm5 = vcmp.eq.f32.partialorder %v810_v4, 8.507059e+37  ;;  %vm823_vm8 = vmor %vm821_vm7, %vm822_vm6 }
 0x37e   :  { %v818_v50 = vsub.f32 1.0, %v817_v47 }
 0x380   :  { %v819_v61 = vmul.f32 %v1359_v48, %v818_v50  ;;  %v841_v50 = vld [vmem:[#allocation2 + $0x20] sm:$0xc] }
 0x381   :  { %v1361_v49 = vpop.eup %1360 }
 0x382   :  { %v802_v59 = vmul.f32 %v1361_v49, %v799_v52  ;;  %vm807_vm2 = vweird.f32 %v1361_v49  ;;  %v820_v9 = vadd.f32 %v1359_v48, %v819_v61 }
 0x383   :  { %vm808_vm4 = vmor %vm806_vm3, %vm807_vm2 }
 0x384   :  { %v803_v56 = vsub.f32 1.0, %v802_v59  ;;  %v824_v45 = vsel %vm823_vm8, %v1359_v48, %v820_v9 }
 0x385   :  { %v829_v0 = vsel %vm826_vm9, %v828_v10, %v824_v45  ;;  %v2375_v45 = vld [vmem:[#allocation34_spill] sm:$0xff] }
 0x386   :  { %v804_v25 = vmul.f32 %v1361_v49, %v803_v56  ;;  %v835_v3 = vsub.f32 1.0, %v829_v0  ;;  %v837_v26 = vmul.f32 %v829_v0, %v2152_v51  ;;  %v984_v10 = vadd.f32 %v2375_v45, %v973_v58 }
 0x388   :  { %v805_v63 = vadd.f32 %v1361_v49, %v804_v25 }
 0x38a   :  { %v809_v18 = vsel %vm808_vm4, %v1361_v49, %v805_v63 }
 0x38b   :  { %v814_v1 = vsel %vm811_vm5, %v813_v55, %v809_v18  ;;  %v2374_v55 = vld [vmem:[#allocation33_spill] sm:$0xff] }
 0x38c   :  { %v832_v5 = vmul.f32 %v831_v60, %v814_v1  ;;  %v852_v8 = vadd.f32 %v2374_v55, %v841_v50 }
 0x38e   :  { %v833_v57 = vadd.f32 %v832_v5, %v727_v62 }
 0x390   :  { %1362 = vtanh.f32 %v833_v57 }
 0x396   :  { %v1363_v22 = vpop.eup %1362 }
 0x397   :  { %v836_v23 = vmul.f32 %v1363_v22, %v835_v3  ;;  %v974_v22 = vld [vmem:[#allocation2 + $0x18] sm:$0x30] }
 0x399   :  { %v2226_v27 = vadd.f32 %v837_v26, %v836_v23 }
 0x39b   :  { %869 = vmatmul.f32.vlgmr.msra.gmra.mxu2 %v2226_v27  ;;  %889 = vmatmul.f32.vlgmr.msra.gmra.mxu3 %v2226_v27  ;;  %v969_v63 = vrot.slane %v2226_v27, 6 }
 0x39c   :  { %909 = vmatmul.f32.vlgmr.msrb.gmra.mxu0 %v2226_v27  ;;  %1166 = vmatpush.msra.mxu2 %v2019_v11  ;;  %v839_v11 = vld [vmem:[#allocation2] sm:$0xc] }
 0x39d   :  { %v2376_v27 = vld [vmem:[#allocation35_spill] sm:$0xff] }
 0x39e   :  { %1167 = vmatpush.msra.mxu2 %v2028_v14  ;;  %v840_v14 = vld [vmem:[#allocation2 + $0x18] sm:$0xc] }
 0x3a0   :  { %1168 = vmatpush.msra.mxu2 %v2037_v17 }
 0x3a2   :  { %1169 = vmatpush.msra.mxu2 %v2046_v21 }
 0x3a4   :  { %1170 = vmatpush.msra.mxu2 %v2055_v24  ;;  %v2372_v24 = vld [vmem:[#allocation31_spill] sm:$0xff] }
 0x3a6   :  { %1171 = vmatpush.msra.mxu2 %v2064_v28  ;;  %v850_v28 = vadd.f32 %v2372_v24, %v839_v11  ;;  %v985_v11 = vadd.f32 %v2376_v27, %v974_v22 }
 0x3a8   :  { %1172 = vmatpush.msra.mxu2 %v2073_v31 }
 0x3aa   :  { %1173 = vmatpush.msra.mxu2 %v2082_v34  ;;  %v2373_v34 = vld [vmem:[#allocation32_spill] sm:$0xff] }
 0x3ab   :  { %v851_v51 = vadd.f32 %v2373_v34, %v840_v14 }
 0x3ac   :  { %1174 = vmatpush.msra.mxu2 %v2181_v39 }
 0x3ae   :  { %1175 = vmatpush.msra.mxu2 %v2186_v7 }
 0x3b0   :  { %1176 = vmatpush.msra.mxu2 %v2191_v12 }
 0x3b2   :  { %1177 = vmatpush.msra.mxu2 %v2196_v13 }
 0x3b4   :  { %1178 = vmatpush.msra.mxu2 %v2201_v15 }
 0x3b6   :  { %1179 = vmatpush.msra.mxu2 %v2206_v16 }
 0x3b8   :  { %1180 = vmatpush.msra.mxu2 %v2211_v19 }
 0x3ba   :  { %1181 = vmatpush.msra.mxu2 %v2216_v20 }
 0x419   :  { %v910_v33 = vpop.f32.mrf.mxu0 }
 0x41a   :  { %v959_v38 = vadd.f32 %v2252_v40, %v910_v33 }
 0x41c   :  { %v961_v2 = vrot.slane %v959_v38, 6  ;;  %v2377_v38 = vld [vmem:[#allocation36_spill] sm:$0xff] }
 0x41e   :  { %v870_v17 = vpop.f32.mrf.mxu2  ;;  %v890_v21 = vpop.f32.mrf.mxu3 }
 0x41f   :  { %v915_v31 = vrot.slane %v870_v17, 6  ;;  %v916_v39 = vrot.slane %v890_v21, 6 }
 0x421   :  { %v919_v7 = vadd.f32 %v915_v31, %v850_v28  ;;  %v920_v12 = vadd.f32 %v916_v39, %v851_v51 }
 0x423   :  { %v1302_v13 = vmul.f32 -1.442695, %v919_v7  ;;  %v1303_v15 = vmul.f32 -1.442695, %v920_v12 }
 0x425   :  { %1364 = vpow2.f32 %v1302_v13 }
 0x426   :  { %1366 = vpow2.f32 %v1303_v15 }
 0x42b   :  { %v1365_v16 = vpop.eup %1364 }
 0x42c   :  { %v1367_v19 = vpop.eup %1366  ;;  %v927_v29 = vadd.f32 1.0, %v1365_v16 }
 0x42d   :  { %v928_v20 = vadd.f32 1.0, %v1367_v19 }
 0x42e   :  { %1368 = vrcp.f32 %v927_v29  ;;  %v940_v41 = vand.u32 2147483648, %v927_v29  ;;  %v938_v46 = vand.u32 2147483647, %v927_v29  ;;  %vm934_vm12 = vweird.f32 %v927_v29 }
 0x42f   :  { %1370 = vrcp.f32 %v928_v20  ;;  %v955_v52 = vand.u32 2147483648, %v928_v20  ;;  %v953_v47 = vand.u32 2147483647, %v928_v20  ;;  %vm949_vm14 = vweird.f32 %v928_v20 }
 0x430   :  { %v941_v59 = vor.u32 1.1754944e-38, %v940_v41  ;;  %vm939_vm15 = vcmp.eq.f32.partialorder %v938_v46, 8.507059e+37 }
 0x431   :  { %v956_v4 = vor.u32 1.1754944e-38, %v955_v52  ;;  %vm954_vm1 = vcmp.eq.f32.partialorder %v953_v47, 8.507059e+37 }
 0x434   :  { %v1369_v30 = vpop.eup %1368 }
 0x435   :  { %v1371_v32 = vpop.eup %1370  ;;  %v930_v35 = vmul.f32 %v1369_v30, %v927_v29  ;;  %vm935_vm10 = vweird.f32 %v1369_v30 }
 0x436   :  { %v945_v36 = vmul.f32 %v1371_v32, %v928_v20  ;;  %vm950_vm11 = vweird.f32 %v1371_v32  ;;  %vm936_vm13 = vmor %vm934_vm12, %vm935_vm10 }
 0x437   :  { %v931_v37 = vsub.f32 1.0, %v930_v35  ;;  %vm951_vm0 = vmor %vm949_vm14, %vm950_vm11 }
 0x438   :  { %v946_v43 = vsub.f32 1.0, %v945_v36 }
 0x439   :  { %v932_v42 = vmul.f32 %v1369_v30, %v931_v37 }
 0x43a   :  { %v947_v48 = vmul.f32 %v1371_v32, %v946_v43 }
 0x43b   :  { %v933_v49 = vadd.f32 %v1369_v30, %v932_v42 }
 0x43c   :  { %v948_v56 = vadd.f32 %v1371_v32, %v947_v48 }
 0x43d   :  { %v937_v25 = vsel %vm936_vm13, %v1369_v30, %v933_v49  ;;  %v975_v30 = vld [vmem:[#allocation2 + $0x20] sm:$0x30] }
 0x43e   :  { %v942_v61 = vsel %vm939_vm15, %v941_v59, %v937_v25  ;;  %v952_v44 = vsel %vm951_vm0, %v1371_v32, %v948_v56  ;;  %v986_v41 = vadd.f32 %v2377_v38, %v975_v30  ;;  %v1245_v38 = vlaneseq }
 0x43f   :  { %v957_v54 = vsel %vm954_vm1, %v956_v4, %v952_v44  ;;  %v963_v60 = vmul.f32 %v961_v2, %v942_v61 }
 0x440   :  { %v971_v18 = vmul.f32 %v969_v63, %v957_v54  ;;  %v966_v9 = vsub.f32 1.0, %v957_v54  ;;  %v1114_v54 = vld.sshfl [vmem:[#allocation1] sm:$0xff pattern:$0x73625140] }
 0x441   :  { %v964_v1 = vadd.f32 %v963_v60, %v852_v8  ;;  %v1109_v8 = vld [vmem:[#allocation2] sm:$0xc0]  ;;  %v1110_v60 = vld [vmem:[#allocation2 + $0x18] sm:$0xc0] }
 0x443   :  { %1372 = vtanh.f32 %v964_v1 }
 0x449   :  { %v1373_v6 = vpop.eup %1372 }
 0x44a   :  { %v967_v62 = vmul.f32 %v1373_v6, %v966_v9  ;;  %v1120_v6 = vadd.f32 %v1114_v54, %v1109_v8 }
 0x44c   :  { %v2257_v53 = vadd.f32 %v971_v18, %v967_v62  ;;  %v1115_v18 = vld.sshfl [vmem:[#allocation1 + $0x8] sm:$0xff pattern:$0x73625140] }
 0x44e   :  { %v988_v5 = vrot.slane %v2257_v53, 2  ;;  %v1105_v50 = vrot.slane %v2257_v53, 6  ;;  %v1121_v53 = vadd.f32 %v1115_v18, %v1110_v60 }
 0x450   :  { %1006 = vmatmul.f32.vlgmr.msrb.gmra.mxu1 %v988_v5  ;;  %1026 = vmatmul.f32.vlgmr.msrb.gmra.mxu2 %v988_v5 }
 0x451   :  { %1046 = vmatmul.f32.vlgmr.msrb.gmra.mxu3 %v988_v5 }
 0x4cd   :  { %v1007_v57 = vpop.f32.mrf.mxu1 }
 0x4ce   :  { %v1052_v0 = vrot.slane %v1007_v57, 4 }
 0x4d0   :  { %v1056_v3 = vadd.f32 %v1052_v0, %v984_v10 }
 0x4d2   :  { %v1304_v23 = vmul.f32 -1.442695, %v1056_v3 }
 0x4d3   :  { %v1027_v26 = vpop.f32.mrf.mxu2 }
 0x4d4   :  { %1374 = vpow2.f32 %v1304_v23  ;;  %v1053_v14 = vrot.slane %v1027_v26, 4  ;;  %v1047_v7 = vpop.f32.mrf.mxu3 }
 0x4d5   :  { %v1096_v19 = vadd.f32 %v2252_v40, %v1047_v7 }
 0x4d6   :  { %v1057_v17 = vadd.f32 %v1053_v14, %v985_v11 }
 0x4d7   :  { %v1098_v37 = vrot.slane %v1096_v19, 4 }
 0x4d8   :  { %v1305_v21 = vmul.f32 -1.442695, %v1057_v17 }
 0x4da   :  { %v1375_v24 = vpop.eup %1374  ;;  %1376 = vpow2.f32 %v1305_v21 }
 0x4db   :  { %v1064_v28 = vadd.f32 1.0, %v1375_v24 }
 0x4dd   :  { %1378 = vrcp.f32 %v1064_v28  ;;  %v1077_v13 = vand.u32 2147483648, %v1064_v28  ;;  %v1075_v16 = vand.u32 2147483647, %v1064_v28  ;;  %vm1071_vm3 = vweird.f32 %v1064_v28 }
 0x4df   :  { %v1078_v33 = vor.u32 1.1754944e-38, %v1077_v13  ;;  %vm1076_vm5 = vcmp.eq.f32.partialorder %v1075_v16, 8.507059e+37  ;;  %v1116_v13 = vld.sshfl [vmem:[#allocation1 + $0x10] sm:$0xff pattern:$0x73625140] }
 0x4e0   :  { %v1377_v31 = vpop.eup %1376 }
 0x4e1   :  { %v1065_v34 = vadd.f32 1.0, %v1377_v31 }
 0x4e3   :  { %v1379_v51 = vpop.eup %1378  ;;  %1380 = vrcp.f32 %v1065_v34  ;;  %v1092_v42 = vand.u32 2147483648, %v1065_v34  ;;  %v1090_v48 = vand.u32 2147483647, %v1065_v34  ;;  %vm1086_vm7 = vweird.f32 %v1065_v34 }
 0x4e4   :  { %v1067_v39 = vmul.f32 %v1379_v51, %v1064_v28  ;;  %vm1072_vm2 = vweird.f32 %v1379_v51 }
 0x4e5   :  { %vm1073_vm4 = vmor %vm1071_vm3, %vm1072_vm2  ;;  %v1093_v59 = vor.u32 1.1754944e-38, %v1092_v42  ;;  %vm1091_vm9 = vcmp.eq.f32.partialorder %v1090_v48, 8.507059e+37  ;;  %vm1249_vm3 = vcmask 1047558  }
 0x4e6   :  { %v1068_v12 = vsub.f32 1.0, %v1067_v39 }
 0x4e8   :  { %v1069_v15 = vmul.f32 %v1379_v51, %v1068_v12  ;;  %v1111_v12 = vld [vmem:[#allocation2 + $0x20] sm:$0xc0] }
 0x4e9   :  { %v1381_v29 = vpop.eup %1380  ;;  %v1122_v30 = vadd.f32 %v1116_v13, %v1111_v12 }
 0x4ea   :  { %v1082_v20 = vmul.f32 %v1381_v29, %v1065_v34  ;;  %v1070_v32 = vadd.f32 %v1379_v51, %v1069_v15  ;;  %vm1087_vm6 = vweird.f32 %v1381_v29 }
 0x4eb   :  { %vm1088_vm8 = vmor %vm1086_vm7, %vm1087_vm6 }
 0x4ec   :  { %v1083_v35 = vsub.f32 1.0, %v1082_v20  ;;  %v1074_v36 = vsel %vm1073_vm4, %v1379_v51, %v1070_v32 }
 0x4ed   :  { %v1079_v43 = vsel %vm1076_vm5, %v1078_v33, %v1074_v36 }
 0x4ee   :  { %v1084_v46 = vmul.f32 %v1381_v29, %v1083_v35  ;;  %v1100_v52 = vmul.f32 %v1098_v37, %v1079_v43  ;;  %v1246_v43 = vand.u32 127, %v1245_v38 }
 0x4f0   :  { %v1101_v47 = vadd.f32 %v1100_v52, %v986_v41  ;;  %v1085_v49 = vadd.f32 %v1381_v29, %v1084_v46  ;;  %vm1247_vm2 = vcmp.lt.s32.totalorder %v1246_v43, 6 }
 0x4f2   :  { %1382 = vtanh.f32 %v1101_v47  ;;  %v1089_v56 = vsel %vm1088_vm8, %v1381_v29, %v1085_v49 }
 0x4f3   :  { %v1094_v2 = vsel %vm1091_vm9, %v1093_v59, %v1089_v56 }
 0x4f4   :  { %v1107_v25 = vmul.f32 %v1105_v50, %v1094_v2  ;;  %v1103_v4 = vsub.f32 1.0, %v1094_v2 }
 0x4f8   :  { %v1383_v61 = vpop.eup %1382 }
 0x4f9   :  { %v1104_v44 = vmul.f32 %v1383_v61, %v1103_v4 }
 0x4fb   :  { %v2265_v63 = vadd.f32 %v1107_v25, %v1104_v44 }
 0x4fd   :  { %v1124_v55 = vrot.slane %v2265_v63, 4  ;;  %v1241_v46 = vrot.slane %v2265_v63, 6 }
 0x4ff   :  { %1142 = vmatmul.f32.vlgmr.msra.gmra.mxu0 %v1124_v55  ;;  %1162 = vmatmul.f32.vlgmr.msra.gmra.mxu1 %v1124_v55 }
 0x500   :  { %1182 = vmatmul.f32.vlgmr.msra.gmra.mxu2 %v1124_v55 }
 0x57c   :  { %v1143_v1 = vpop.f32.mrf.mxu0  ;;  %v1163_v9 = vpop.f32.mrf.mxu1 }
 0x57d   :  { %v1188_v62 = vrot.slane %v1143_v1, 2  ;;  %v1189_v5 = vrot.slane %v1163_v9, 2 }
 0x57f   :  { %v1192_v58 = vadd.f32 %v1188_v62, %v1120_v6  ;;  %v1193_v57 = vadd.f32 %v1189_v5, %v1121_v53 }
 0x581   :  { %v1306_v45 = vmul.f32 -1.442695, %v1192_v58  ;;  %v1307_v10 = vmul.f32 -1.442695, %v1193_v57 }
 0x583   :  { %1384 = vpow2.f32 %v1306_v45  ;;  %v1183_v14 = vpop.f32.mrf.mxu2 }
 0x584   :  { %1386 = vpow2.f32 %v1307_v10  ;;  %v1232_v51 = vadd.f32 %v2252_v40, %v1183_v14 }
 0x586   :  { %v1234_v19 = vrot.slane %v1232_v51, 2 }
 0x589   :  { %v1385_v0 = vpop.eup %1384 }
 0x58a   :  { %v1387_v3 = vpop.eup %1386  ;;  %v1200_v22 = vadd.f32 1.0, %v1385_v0 }
 0x58b   :  { %v1201_v23 = vadd.f32 1.0, %v1387_v3 }
 0x58c   :  { %1388 = vrcp.f32 %v1200_v22  ;;  %v1213_v24 = vand.u32 2147483648, %v1200_v22  ;;  %v1211_v34 = vand.u32 2147483647, %v1200_v22  ;;  %vm1207_vm11 = vweird.f32 %v1200_v22 }
 0x58d   :  { %1390 = vrcp.f32 %v1201_v23  ;;  %v1228_v33 = vand.u32 2147483648, %v1201_v23  ;;  %vm1222_vm15 = vweird.f32 %v1201_v23  ;;  %v1226_v35 = vand.u32 2147483647, %v1201_v23 }
 0x58e   :  { %v1214_v15 = vor.u32 1.1754944e-38, %v1213_v24  ;;  %vm1212_vm13 = vcmp.eq.f32.partialorder %v1211_v34, 8.507059e+37 }
 0x58f   :  { %v1229_v37 = vor.u32 1.1754944e-38, %v1228_v33  ;;  %vm1227_vm1 = vcmp.eq.f32.partialorder %v1226_v35, 8.507059e+37 }
 0x592   :  { %v1389_v26 = vpop.eup %1388 }
 0x593   :  { %v1391_v27 = vpop.eup %1390  ;;  %v1203_v11 = vmul.f32 %v1389_v26, %v1200_v22  ;;  %vm1208_vm10 = vweird.f32 %v1389_v26 }
 0x594   :  { %v1218_v17 = vmul.f32 %v1391_v27, %v1201_v23  ;;  %vm1209_vm12 = vmor %vm1207_vm11, %vm1208_vm10  ;;  %vm1223_vm14 = vweird.f32 %v1391_v27 }
 0x595   :  { %v1204_v21 = vsub.f32 1.0, %v1203_v11  ;;  %vm1224_vm0 = vmor %vm1222_vm15, %vm1223_vm14 }
 0x596   :  { %v1219_v28 = vsub.f32 1.0, %v1218_v17 }
 0x597   :  { %v1205_v31 = vmul.f32 %v1389_v26, %v1204_v21 }
 0x598   :  { %v1220_v39 = vmul.f32 %v1391_v27, %v1219_v28 }
 0x599   :  { %v1206_v7 = vadd.f32 %v1389_v26, %v1205_v31 }
 0x59a   :  { %v1221_v20 = vadd.f32 %v1391_v27, %v1220_v39 }
 0x59b   :  { %v1210_v16 = vsel %vm1209_vm12, %v1389_v26, %v1206_v7 }
 0x59c   :  { %v1215_v29 = vsel %vm1212_vm13, %v1214_v15, %v1210_v16  ;;  %v1225_v40 = vsel %vm1224_vm0, %v1391_v27, %v1221_v20 }
 0x59d   :  { %v1236_v32 = vmul.f32 %v1234_v19, %v1215_v29  ;;  %v1230_v41 = vsel %vm1227_vm1, %v1229_v37, %v1225_v40 }
 0x59e   :  { %v1239_v42 = vsub.f32 1.0, %v1230_v41  ;;  %v1243_v47 = vmul.f32 %v1241_v46, %v1230_v41 }
 0x59f   :  { %v1237_v36 = vadd.f32 %v1236_v32, %v1122_v30 }
 0x5a1   :  { %1392 = vtanh.f32 %v1237_v36 }
 0x5a7   :  { %v1393_v52 = vpop.eup %1392 }
 0x5a8   :  { %v1240_v48 = vmul.f32 %v1393_v52, %v1239_v42 }
 0x5aa   :  { %v1244_v49 = vadd.f32 %v1243_v47, %v1240_v48 }
 0x5ac   :  { %v1248_v59 = vsel %vm1247_vm2, %v1244_v49, -inf }
 0x5ad   :  { %v1250_v50 = vsel %vm1249_vm3, %v1248_v59, -inf }
 0x5ae   :  { %1251 = vmax.xlane.f32.xlu0 %v1250_v50 }
 0x621   :  { %v1252_v56 = vpop.xlane.xlu0 %1251 }
 0x622   :  { %v1253_v2 = vsub.f32 %v1244_v49, %v1252_v56 }
 0x624   :  { %v1254_v25 = vmul.f32 1.442695, %v1253_v2 }
 0x626   :  { %1394 = vpow2.f32 %v1254_v25 }
 0x62c   :  { %v1395_v4 = vpop.eup %1394 }
 0x62d   :  { %v1256_v61 = vsel %vm1247_vm2, %v1395_v4, 0.0 }
 0x62e   :  { %v1257_v44 = vsel %vm1249_vm3, %v1256_v61, 0.0 }
 0x62f   :  { %1258 = vadd.xlane.f32.xlu0 %v1257_v44 }
 0x6a2   :  { %v1259_v55 = vpop.xlane.xlu0 %1258 }
 0x6a3   :  { %1396 = vrcp.f32 %v1259_v55 }
 0x6a9   :  { %v1397_v63 = vpop.eup %1396 }
 0x6aa   :  { %v1261_v8 = vmul.f32 %v1397_v63, %v1259_v55 }
 0x6ac   :  { %v1262_v54 = vsub.f32 2.0, %v1261_v8 }
 0x6ae   :  { %v1263_v60 = vmul.f32 %v1397_v63, %v1262_v54 }
 0x6b0   :  { %v1264_v18 = vmul.f32 %v1263_v60, %v1256_v61 }
 0x6b2   :  { %1265 = vst [vmem:[#allocation6 - $0x6] sm:$0xc0] %v1264_v18 }
 0x6b3   :  { %1276 = dma.vmem_to_hbm [thread:$0]  %s1272_s12, 32, %s1274_s15, [#allocation5]  }
 0x6b4   :  { %1497 = dma.done.wait [#allocation5], 32  }
 0x6b5   :  { %1498 = vsyncadd [#allocation5], 4294967264 }
 0x6b6   :  { %1281 = vsyncpa [#allocation4], 1 }
 0x6b7   :  { %1282 = vsyncpa [#allocation5], 1 }

</bundles_post_ra>
